<compile_context>
chip_gen: v7x
topology: tpu7x:2x2x1
jax: 0.10.0
libtpu: 0.0.40
codegen_flags: <defaults>
</compile_context>

<pallas_src>
import math

import jax
import jax.numpy as jnp
from jax.experimental import pallas as pl
from jax.experimental.pallas import tpu as pltpu


def _round_up(x, m):
    return ((x + m - 1) // m) * m


def _gelu(x, approximate):
    if approximate:
        # tanh-approximate GELU: the tanh goes to the EUP slot (cheap on TPU).
        c = math.sqrt(2.0 / math.pi)
        return 0.5 * x * (1.0 + jnp.tanh(c * (x + 0.044715 * x * x * x)))
    # Exact (erf) form: bit-parity with PyTorch nn.GELU() default, but VALU-heavy.
    return 0.5 * x * (1.0 + jax.lax.erf(x * (1.0 / math.sqrt(2.0))))


def _make_mlp_kernel(approximate_gelu):
    def kernel(x_ref, w0_ref, b0_ref, w1_ref, b1_ref, w2_ref, b2_ref, o_ref):
        x = x_ref[...]                                   # (tm, H) native dtype -> MXU

        # Layer 0: Linear + GELU (f32 accumulation, f32 elementwise math)
        h = jnp.dot(x, w0_ref[...], preferred_element_type=jnp.float32)
        h = _gelu(h + b0_ref[...], approximate_gelu)

        # Layer 1: Linear + GELU
        h = jnp.dot(h.astype(w1_ref.dtype), w1_ref[...],
                    preferred_element_type=jnp.float32)
        h = _gelu(h + b1_ref[...], approximate_gelu)

        # Layer 2: Linear + ReLU
        h = jnp.dot(h.astype(w2_ref.dtype), w2_ref[...],
                    preferred_element_type=jnp.float32)
        h = jnp.maximum(h + b2_ref[...], 0.0)

        # Residual read deferred to the epilogue (keeps vreg pressure low in the body).
        o_ref[...] = (x_ref[...].astype(jnp.float32) + h).astype(o_ref.dtype)

    return kernel


def _pick_tm(M, tm_request, sublane):
    """Sublane-aligned row tile; never larger than round_up(M, sublane)."""
    tm = min(tm_request, _round_up(M, sublane))
    tm = max(sublane, (tm // sublane) * sublane)
    return tm


def _vmem_capacity_bytes():
    try:
        info = pltpu.get_tpu_info()
        cap = getattr(info, "vmem_capacity_bytes", None)
        if cap:
            return int(cap)
    except Exception:
        pass
    return 64 << 20  # conservative floor (v7x per-TC VMEM)


def mlp_layer(features, params, *, tm=256, approximate_gelu=True,
              donate_features=False):
    """features: (M, H).  params: 3x (W, b) with W: (H, H) [in, out], b: (H,)."""
    M, H = features.shape
    x_itemsize = jnp.dtype(features.dtype).itemsize
    w_itemsize = jnp.dtype(params[0][0].dtype).itemsize

    # Lane-dense hidden dim: pad to a multiple of 128, slice back at the end.
    Hp = _round_up(H, 128)
    pad_h = Hp - H

    sublane = 8 if x_itemsize >= 4 else 16
    tm = _pick_tm(M, tm, sublane)
    grid = (pl.cdiv(M, tm),)

    (w0, b0), (w1, b1), (w2, b2) = params

    def prep_w(w):
        if pad_h:
            w = jnp.pad(w, ((0, pad_h), (0, pad_h)))
        return w

    def prep_b(b):
        b = b.astype(jnp.float32).reshape(1, H)
        if pad_h:
            b = jnp.pad(b, ((0, 0), (0, pad_h)))
        return b

    x_in = jnp.pad(features, ((0, 0), (0, pad_h))) if pad_h else features
    w0, w1, w2 = prep_w(w0), prep_w(w1), prep_w(w2)
    b0, b1, b2 = prep_b(b0), prep_b(b1), prep_b(b2)

    row_spec = pl.BlockSpec((tm, Hp), lambda i: (i, 0))
    # Whole-array, single-buffered VMEM residency for weights/biases (constant
    # across the row grid -> copied in exactly once).
    resident = pl.BlockSpec(memory_space=pltpu.MemorySpace.VMEM)

    # Honest VMEM residency estimate, capped per-generation.
    w_bytes = 3 * Hp * Hp * w_itemsize
    b_bytes = 3 * Hp * 4
    io_bytes = 2 * 2 * tm * Hp * x_itemsize        # double-buffered in + out row tiles
    interm_bytes = 3 * tm * Hp * 4                 # f32 intermediates
    needed = w_bytes + b_bytes + io_bytes + interm_bytes
    cap = _vmem_capacity_bytes()
    vmem_limit = int(min(max(int(1.25 * needed) + (4 << 20), 32 << 20),
                         int(0.85 * cap)))

    cost = pl.CostEstimate(
        flops=6 * M * H * H,                                   # three (M,H)x(H,H) GEMMs
        transcendentals=(2 * M * H) if approximate_gelu else 0,  # tanh-GELU on the EUP
        bytes_accessed=2 * M * H * x_itemsize + 3 * H * H * w_itemsize + 3 * H * 4,
    )

    # Only alias the features buffer onto the output if the caller donated it, or if
    # the wrapper already made a fresh (padded) copy -- never clobber caller state.
    aliases = {0: 0} if (donate_features or pad_h) else {}

    out = pl.pallas_call(
        _make_mlp_kernel(approximate_gelu),
        out_shape=jax.ShapeDtypeStruct((M, Hp), features.dtype),
        grid_spec=pltpu.PrefetchScalarGridSpec(
            num_scalar_prefetch=0,
            grid=grid,
            in_specs=[row_spec, resident, resident, resident, resident,
                      resident, resident],
            out_specs=row_spec,
        ),
        input_output_aliases=aliases,
        cost_estimate=cost,
        compiler_params=pltpu.CompilerParams(
            dimension_semantics=("parallel",),
            vmem_limit_bytes=vmem_limit,
        ),
    )(x_in, w0, b0, w1, b1, w2, b2)

    return out[:, :H] if pad_h else out


def init_params(key, hidden, dtype=jnp.float32):
    """Deterministic init mimicking nn.Linear (uniform +/- 1/sqrt(fan_in))."""
    params = []
    bound = 1.0 / math.sqrt(hidden)
    for i in range(3):
        kw, kb = jax.random.split(jax.random.fold_in(key, i))
        # Stored as (in, out) so the kernel does x @ W (== PyTorch x @ weight.T).
        w = jax.random.uniform(kw, (hidden, hidden), jnp.float32, -bound, bound)
        b = jax.random.uniform(kb, (hidden,), jnp.float32, -bound, bound)
        params.append((w.astype(dtype), b.astype(jnp.float32)))
    return params


def mlp_layer_ref(features, params, *, approximate_gelu=True):
    x = features.astype(jnp.float32)
    (w0, b0), (w1, b1), (w2, b2) = params
    x = _gelu(x @ w0.astype(jnp.float32) + b0, approximate_gelu)
    x = _gelu(x @ w1.astype(jnp.float32) + b1, approximate_gelu)
    x = jnp.maximum(x @ w2.astype(jnp.float32) + b2, 0.0)
    return features.astype(jnp.float32) + x


if __name__ == "__main__":
    key = jax.random.PRNGKey(0)

    # Case 1: f32, lane-aligned hidden, ragged batch (tail block handled by cdiv grid).
    batch, hidden = 320, 128
    kx, kp = jax.random.split(key)
    features = jax.random.normal(kx, (batch, hidden), jnp.float32)
    params = init_params(kp, hidden)
    ref = mlp_layer_ref(features, params)

    out = jax.block_until_ready(mlp_layer(features, params))
    assert out.shape == (batch, hidden) and out.dtype == jnp.float32
    assert jnp.allclose(out, ref, atol=1e-4, rtol=1e-4), "f32 mismatch vs reference"

    # Case 2: bf16 MXU feeds (weights + activations), f32 elementwise math in-kernel.
    features_bf16 = features.astype(jnp.bfloat16)
    params_bf16 = [(w.astype(jnp.bfloat16), b) for w, b in params]
    out_bf16 = jax.block_until_ready(mlp_layer(features_bf16, params_bf16))
    assert out_bf16.shape == (batch, hidden) and out_bf16.dtype == jnp.bfloat16
    assert jnp.allclose(out_bf16.astype(jnp.float32), ref, atol=0.1, rtol=0.1), \
        "bf16 mismatch vs reference"

    # Case 3: hidden not 128-aligned -> padded to lane width in the wrapper.
    batch2, hidden2 = 64, 96
    kx2, kp2 = jax.random.split(jax.random.fold_in(key, 1))
    f2 = jax.random.normal(kx2, (batch2, hidden2), jnp.float32)
    p2 = init_params(kp2, hidden2)
    ref2 = mlp_layer_ref(f2, p2)
    out2 = jax.block_until_ready(mlp_layer(f2, p2))
    assert out2.shape == (batch2, hidden2) and out2.dtype == jnp.float32
    assert jnp.allclose(out2, ref2, atol=1e-4, rtol=1e-4), "padded-H mismatch vs reference"

    print("KERNEL_OK")
</pallas_src>

<mosaic_0001>
module attributes {stable_mosaic.version = 11 : i64} {
  func.func @kernel(%arg0: i32, %arg1: memref<256x128xf32, #tpu.memory_space<vmem>>, %arg2: memref<128x128xf32, #tpu.memory_space<vmem>>, %arg3: memref<1x128xf32, #tpu.memory_space<vmem>>, %arg4: memref<128x128xf32, #tpu.memory_space<vmem>>, %arg5: memref<1x128xf32, #tpu.memory_space<vmem>>, %arg6: memref<128x128xf32, #tpu.memory_space<vmem>>, %arg7: memref<1x128xf32, #tpu.memory_space<vmem>>, %arg8: memref<256x128xf32, #tpu.memory_space<vmem>>) attributes {dimension_semantics = [#tpu.dimension_semantics<parallel>], iteration_bounds = array<i64: 2>, scalar_prefetch = 0 : i64, scratch_operands = 0 : i64, tpu.core_type = #tpu.core_type<tc>, window_params = [{transform_indices = @transform_0, window_bounds = array<i64: 256, 128>}, {pipeline_mode = #tpu.pipeline_mode<synchronous>, transform_indices = @transform_1, window_bounds = array<i64: 128, 128>}, {pipeline_mode = #tpu.pipeline_mode<synchronous>, transform_indices = @transform_2, window_bounds = array<i64: 1, 128>}, {pipeline_mode = #tpu.pipeline_mode<synchronous>, transform_indices = @transform_3, window_bounds = array<i64: 128, 128>}, {pipeline_mode = #tpu.pipeline_mode<synchronous>, transform_indices = @transform_4, window_bounds = array<i64: 1, 128>}, {pipeline_mode = #tpu.pipeline_mode<synchronous>, transform_indices = @transform_5, window_bounds = array<i64: 128, 128>}, {pipeline_mode = #tpu.pipeline_mode<synchronous>, transform_indices = @transform_6, window_bounds = array<i64: 1, 128>}, {transform_indices = @transform_7, window_bounds = array<i64: 256, 128>}]} {
    %c0 = arith.constant 0 : index
    %c0_0 = arith.constant 0 : index
    %0 = vector.load %arg1[%c0, %c0_0] : memref<256x128xf32, #tpu.memory_space<vmem>>, vector<256x128xf32>
    %c0_1 = arith.constant 0 : index
    %c0_2 = arith.constant 0 : index
    %1 = vector.load %arg2[%c0_1, %c0_2] : memref<128x128xf32, #tpu.memory_space<vmem>>, vector<128x128xf32>
    %cst = arith.constant dense<0.000000e+00> : vector<256x128xf32>
    %2 = tpu.matmul %0, %1, %cst {dimension_numbers = #tpu.dot_dimension_numbers<[1], [0], [0], [1], [0, 0, 1, 1], [], []>} : vector<256x128xf32>, vector<128x128xf32>, vector<256x128xf32> -> vector<256x128xf32>
    %c0_3 = arith.constant 0 : index
    %c0_4 = arith.constant 0 : index
    %3 = vector.load %arg3[%c0_3, %c0_4] : memref<1x128xf32, #tpu.memory_space<vmem>>, vector<1x128xf32>
    %4 = vector.broadcast %3 : vector<1x128xf32> to vector<256x128xf32>
    %5 = arith.addf %2, %4 : vector<256x128xf32>
    %cst_5 = arith.constant 5.000000e-01 : f32
    %6 = vector.broadcast %cst_5 : f32 to vector<256x128xf32>
    %7 = arith.mulf %6, %5 : vector<256x128xf32>
    %cst_6 = arith.constant 4.471500e-02 : f32
    %8 = vector.broadcast %cst_6 : f32 to vector<256x128xf32>
    %9 = arith.mulf %8, %5 : vector<256x128xf32>
    %10 = arith.mulf %9, %5 : vector<256x128xf32>
    %11 = arith.mulf %10, %5 : vector<256x128xf32>
    %12 = arith.addf %5, %11 : vector<256x128xf32>
    %cst_7 = arith.constant 0.797884583 : f32
    %13 = vector.broadcast %cst_7 : f32 to vector<256x128xf32>
    %14 = arith.mulf %13, %12 : vector<256x128xf32>
    %15 = math.tanh %14 : vector<256x128xf32>
    %cst_8 = arith.constant 1.000000e+00 : f32
    %16 = vector.broadcast %cst_8 : f32 to vector<256x128xf32>
    %17 = arith.addf %16, %15 : vector<256x128xf32>
    %18 = arith.mulf %7, %17 : vector<256x128xf32>
    %c0_9 = arith.constant 0 : index
    %c0_10 = arith.constant 0 : index
    %19 = vector.load %arg4[%c0_9, %c0_10] : memref<128x128xf32, #tpu.memory_space<vmem>>, vector<128x128xf32>
    %cst_11 = arith.constant dense<0.000000e+00> : vector<256x128xf32>
    %20 = tpu.matmul %18, %19, %cst_11 {dimension_numbers = #tpu.dot_dimension_numbers<[1], [0], [0], [1], [0, 0, 1, 1], [], []>} : vector<256x128xf32>, vector<128x128xf32>, vector<256x128xf32> -> vector<256x128xf32>
    %c0_12 = arith.constant 0 : index
    %c0_13 = arith.constant 0 : index
    %21 = vector.load %arg5[%c0_12, %c0_13] : memref<1x128xf32, #tpu.memory_space<vmem>>, vector<1x128xf32>
    %22 = vector.broadcast %21 : vector<1x128xf32> to vector<256x128xf32>
    %23 = arith.addf %20, %22 : vector<256x128xf32>
    %cst_14 = arith.constant 5.000000e-01 : f32
    %24 = vector.broadcast %cst_14 : f32 to vector<256x128xf32>
    %25 = arith.mulf %24, %23 : vector<256x128xf32>
    %cst_15 = arith.constant 4.471500e-02 : f32
    %26 = vector.broadcast %cst_15 : f32 to vector<256x128xf32>
    %27 = arith.mulf %26, %23 : vector<256x128xf32>
    %28 = arith.mulf %27, %23 : vector<256x128xf32>
    %29 = arith.mulf %28, %23 : vector<256x128xf32>
    %30 = arith.addf %23, %29 : vector<256x128xf32>
    %cst_16 = arith.constant 0.797884583 : f32
    %31 = vector.broadcast %cst_16 : f32 to vector<256x128xf32>
    %32 = arith.mulf %31, %30 : vector<256x128xf32>
    %33 = math.tanh %32 : vector<256x128xf32>
    %cst_17 = arith.constant 1.000000e+00 : f32
    %34 = vector.broadcast %cst_17 : f32 to vector<256x128xf32>
    %35 = arith.addf %34, %33 : vector<256x128xf32>
    %36 = arith.mulf %25, %35 : vector<256x128xf32>
    %c0_18 = arith.constant 0 : index
    %c0_19 = arith.constant 0 : index
    %37 = vector.load %arg6[%c0_18, %c0_19] : memref<128x128xf32, #tpu.memory_space<vmem>>, vector<128x128xf32>
    %cst_20 = arith.constant dense<0.000000e+00> : vector<256x128xf32>
    %38 = tpu.matmul %36, %37, %cst_20 {dimension_numbers = #tpu.dot_dimension_numbers<[1], [0], [0], [1], [0, 0, 1, 1], [], []>} : vector<256x128xf32>, vector<128x128xf32>, vector<256x128xf32> -> vector<256x128xf32>
    %c0_21 = arith.constant 0 : index
    %c0_22 = arith.constant 0 : index
    %39 = vector.load %arg7[%c0_21, %c0_22] : memref<1x128xf32, #tpu.memory_space<vmem>>, vector<1x128xf32>
    %40 = vector.broadcast %39 : vector<1x128xf32> to vector<256x128xf32>
    %41 = arith.addf %38, %40 : vector<256x128xf32>
    %cst_23 = arith.constant 0.000000e+00 : f32
    %42 = vector.broadcast %cst_23 : f32 to vector<256x128xf32>
    %43 = arith.maximumf %41, %42 : vector<256x128xf32>
    %c0_24 = arith.constant 0 : index
    %c0_25 = arith.constant 0 : index
    %44 = vector.load %arg1[%c0_24, %c0_25] : memref<256x128xf32, #tpu.memory_space<vmem>>, vector<256x128xf32>
    %45 = arith.addf %44, %43 : vector<256x128xf32>
    %c0_26 = arith.constant 0 : index
    %c0_27 = arith.constant 0 : index
    %46 = vector.load %arg8[%c0_26, %c0_27] : memref<256x128xf32, #tpu.memory_space<vmem>>, vector<256x128xf32>
    tpu.vector_store %arg8[%c0_26, %c0_27], %45 {strides = array<i32>} : memref<256x128xf32, #tpu.memory_space<vmem>>, vector<256x128xf32>,
    return
  }
  func.func @transform_0(%arg0: i32) -> (i32, i32) {
    %c0_i32 = arith.constant 0 : i32
    %c0_i32_0 = arith.constant 0 : i32
    return %arg0, %c0_i32 : i32, i32
  }
  func.func @transform_1(%arg0: i32) -> (i32, i32) {
    %c0_i32 = arith.constant 0 : i32
    %c0_i32_0 = arith.constant 0 : i32
    %c0_i32_1 = arith.constant 0 : i32
    return %c0_i32, %c0_i32_0 : i32, i32
  }
  func.func @transform_2(%arg0: i32) -> (i32, i32) {
    %c0_i32 = arith.constant 0 : i32
    %c0_i32_0 = arith.constant 0 : i32
    %c0_i32_1 = arith.constant 0 : i32
    return %c0_i32, %c0_i32_0 : i32, i32
  }
  func.func @transform_3(%arg0: i32) -> (i32, i32) {
    %c0_i32 = arith.constant 0 : i32
    %c0_i32_0 = arith.constant 0 : i32
    %c0_i32_1 = arith.constant 0 : i32
    return %c0_i32, %c0_i32_0 : i32, i32
  }
  func.func @transform_4(%arg0: i32) -> (i32, i32) {
    %c0_i32 = arith.constant 0 : i32
    %c0_i32_0 = arith.constant 0 : i32
    %c0_i32_1 = arith.constant 0 : i32
    return %c0_i32, %c0_i32_0 : i32, i32
  }
  func.func @transform_5(%arg0: i32) -> (i32, i32) {
    %c0_i32 = arith.constant 0 : i32
    %c0_i32_0 = arith.constant 0 : i32
    %c0_i32_1 = arith.constant 0 : i32
    return %c0_i32, %c0_i32_0 : i32, i32
  }
  func.func @transform_6(%arg0: i32) -> (i32, i32) {
    %c0_i32 = arith.constant 0 : i32
    %c0_i32_0 = arith.constant 0 : i32
    %c0_i32_1 = arith.constant 0 : i32
    return %c0_i32, %c0_i32_0 : i32, i32
  }
  func.func @transform_7(%arg0: i32) -> (i32, i32) {
    %c0_i32 = arith.constant 0 : i32
    %c0_i32_0 = arith.constant 0 : i32
    return %arg0, %c0_i32 : i32, i32
  }
}

</mosaic_0001>

<bundles_post_ra>
// kernel: tpu_custom_call.1
= control target key start
LH: loop header
LB: loop body
LE: loop exit
PB: predicated region body
PF: predicated region fallthrough
CT: control target
= control target key end

     0   :  { %s3906_s0 = inlined_call_operand.hbm [shape: f32[320,128], index: 0, kind: input, shape index: {}]   ;;  %s3907_s1 = inlined_call_operand.hbm [shape: f32[128,128], index: 1, kind: input, shape index: {}]   ;;  %s3908_s2 = inlined_call_operand.vmem [shape: f32[1,128], index: 2, kind: input, shape index: {}]   ;;  %s3909_s3 = inlined_call_operand.hbm [shape: f32[128,128], index: 3, kind: input, shape index: {}]   ;;  %s3910_s4 = inlined_call_operand.vmem [shape: f32[1,128], index: 4, kind: input, shape index: {}]   ;;  %s3911_s5 = inlined_call_operand.hbm [shape: f32[128,128], index: 5, kind: input, shape index: {}]   ;;  %s3912_s6 = inlined_call_operand.vmem [shape: f32[1,128], index: 6, kind: input, shape index: {}]   ;;  %s3913_s7 = inlined_call_operand.hbm [shape: f32[320,128], index: 7, kind: output, shape index: {}]  }
   0x1   :  { %3923 = sst [smem:[#allocation22_spill]] %s3907_s1 }
   0x2   :  { %12 = vsyncpa [#allocation3], 0 }
   0x3   :  { %14 = vsyncpa [#allocation3 + $0x1], 0 }
   0x4   :  { %15 = vsyncpa [#allocation6], 0 }
   0x5   :  { %16 = vsyncpa [#allocation9], 0 }
   0x6   :  { %17 = vsyncpa [#allocation4], 0 }
   0x7   :  { %19 = vsyncpa [#allocation4 + $0x1], 0  ;;  %s2931_s24 = smov 0   ;;  %s2933_s25 = smov 0  }
   0x8   :  { %s2935_s26 = smov 0   ;;  %s2937_s27 = smov 0  }
   0x9 LB: > { %3924 = sst [smem:[#allocation15_spill]] %s2866_s24  ;;  %s2952_s28 = sadd.s32 4294967295, %s2878_s27   ;;  %s2878_s27 = sphi %s2937_s27, %s3953_s27   ;;  %s2874_s26 = sphi %s2935_s26, %s3957_s26   ;;  %s2870_s25 = sphi %s2933_s25, %s3956_s25   ;;  %s2866_s24 = sphi %s2931_s24, %s3955_s24  }
   0xa   : > { %s1927_s29 = sadd.s32 4294967294, %s2878_s27   ;;  %s2956_s30 = sadd.s32 1, %s2878_s27  }
   0xb   : > { %3925 = sst [smem:[#allocation16_spill]] %s2956_s30  ;;  %s32_s8 = sadd.s32 1, %s2874_s26 }
   0xc   : > { %s29_s9 = ssub.s32 %s2878_s27, %s2956_s30  ;;  %p39_p0 = scmp.ne.s32.totalorder %s2874_s26, %s2870_s25 }
   0xd   : > { %p30_p1 = scmp.eq.s32.totalorder %s29_s9, 0  ;;  %p40_p2 = scmp.eq.s32.totalorder %s2878_s27, 0 }
   0xe   : > { %p45_p3 = scmp.ne.s32.totalorder %s2870_s25, %s2866_s24  ;;  %p3914_p4 = scmp.eq.s32.totalorder %s2952_s28, 0 }
   0xf   : > { %s2968_s10 = scalar_select %p30_p1, %s2874_s26, %s32_s8  }
  0x10   : > { %p2970_p5 = por %p40_p2, %p39_p0  ;;  %p2976_p6 = por %p3914_p4, %p45_p3 }
  0x11   : > { %3926 = sst [smem:[#allocation17_spill]] %s2968_s10  ;;  %p195_p7 = scmp.eq.s32.totalorder %s2952_s28, 1 }
  0x12   : > { %s3927_s11 = scalar_select %p2970_p5, 1, 0 }
  0x13   : > { %s3928_s12 = scalar_select %p2976_p6, 1, 0 }
  0x14   : > { %p201_p8 = scmp.eq.s32.totalorder %s1927_s29, 1  ;;  %p1928_p9 = scmp.ge.s32.totalorder %s2878_s27, 1 }
  0x15   : > { %p208_p10 = scmp.lt.s32.totalorder %s2878_s27, 3  ;;  %p2983_p11 = por %p195_p7, %p39_p0 }
  0x16   : > { %p2987_p12 = por %p201_p8, %p45_p3  ;;  %s2880_s16 = smov [#allocation5]  }
  0x17   : > { %s3929_s13 = scalar_select %p2983_p11, 1, 0 }
  0x18   : > { %s3930_s14 = scalar_select %p2987_p12, 1, 0 }
  0x19   : > { %p2991_p13 = pnand %p1928_p9, %p208_p10  ;;  %s220_s17 = sshll.u32 %s2880_s16, 4  ;;  %s221_s17 = int_to_ptr.vmem [resolvable:$true] %s220_s17 }
  0x1a   : > { %3931 = sst [smem:[#allocation18_spill]] %s3930_s14  ;;  %s2881_s19 = smov [#allocation7]  }
  0x1b   : > { %s3932_s15 = scalar_select %p2991_p13, 1, 0 }
  0x1c   : > { %p2470_p1 = pneg %p2991_p13  ;;  %s236_s20 = sshll.u32 %s2881_s19, 4  ;;  %s3003_s20 = int_to_ptr.vmem [resolvable:$true] %s236_s20 }
  0x1d   : > { %s3934_s1 = sld [smem:[#allocation22_spill]] }
  0x1e   : > { %p2999_p2 = pnand %p2470_p1, %p3914_p4 }
  0x20   : > { %p3013_p3 = pneg %p2999_p2 }
  0x23   : > { %s2692_s23 = scalar_lea.hbm %s3934_s1, 2048 }
  0x24   : > { %p2693_p0 = scmp.ne.s32.totalorder %s3934_s1, %s2692_s23  ;;  %p2699_p9 = scmp.lt.u32.totalorder %s2692_s23, %s3934_s1 }
  0x26   : > { %p2695_p7 = pnand %p3013_p3, %p2693_p0 }
  0x28   : > { %p2696_p8 = pneg %p2695_p7 }
  0x2a   : > { %p2701_p10 = pnand %p2699_p9, %p2696_p8 }
  0x2c   : > { %2704 = shalt.err (!%p2701_p10)
}
  0x2d   : > { %s2705_s21 = scalar_lea.vmem %s221_s17, 2048  ;;  %p2713_p11 = scmp.lt.s32.totalorder %s221_s17, %s221_s17 }
  0x2e   : > { %p2706_p1 = scmp.ne.s32.totalorder %s221_s17, %s2705_s21  ;;  %p2714_p6 = scmp.lt.s32.totalorder %s2705_s21, %s2705_s21 }
  0x30   : > { %p2708_p4 = pnand %p2706_p1, %p3013_p3  ;;  %p2715_p13 = por %p2714_p6, %p2713_p11 }
  0x32   : > { %p2709_p12 = pneg %p2708_p4 }
  0x34   : > { %p2716_p5 = pnand %p2715_p13, %p2709_p12 }
  0x36   : > { %2719 = shalt.err (!%p2716_p5)
}
  0x37   : > { %s2882_s22 = smov 128   ;;  %s2883_s29 = smov 8  }
  0x38   : > { %2473 = dma.hbm_to_vmem [thread:$0]  (!%p2999_p2), %s3934_s1, 2048, %s221_s17, [#allocation6], %s2882_s22, %s2882_s22, %s2883_s29  }
  0x39   : > { %s2720_s10 = scalar_lea.hbm %s3909_s3, 2048 }
  0x3a   : > { %p2721_p4 = scmp.ne.s32.totalorder %s3909_s3, %s2720_s10  ;;  %p2727_p11 = scmp.lt.u32.totalorder %s2720_s10, %s3909_s3 }
  0x3c   : > { %p2723_p5 = pnand %p2721_p4, %p3013_p3 }
  0x3e   : > { %p2724_p6 = pneg %p2723_p5 }
  0x40   : > { %p2729_p12 = pnand %p2727_p11, %p2724_p6 }
  0x42   : > { %2732 = shalt.err (!%p2729_p12)
}
  0x43   : > { %s2733_s17 = scalar_lea.vmem %s3003_s20, 2048  ;;  %p2741_p8 = scmp.lt.s32.totalorder %s3003_s20, %s3003_s20 }
  0x44   : > { %p2734_p13 = scmp.ne.s32.totalorder %s3003_s20, %s2733_s17  ;;  %p2742_p9 = scmp.lt.s32.totalorder %s2733_s17, %s2733_s17 }
  0x46   : > { %p2736_p0 = pnand %p2734_p13, %p3013_p3  ;;  %p2743_p10 = por %p2742_p9, %p2741_p8 }
  0x48   : > { %p2737_p7 = pneg %p2736_p0 }
  0x4a   : > { %p2744_p1 = pnand %p2743_p10, %p2737_p7 }
  0x4c   : > { %2747 = shalt.err (!%p2744_p1)
}
  0x4d   : > { %2476 = dma.hbm_to_vmem [thread:$0]  (!%p2999_p2), %s3909_s3, 2048, %s3003_s20, [#allocation6], %s2882_s22, %s2882_s22, %s2883_s29  }
  0x4e   : > { %s2884_s10 = smov [#allocation8]   ;;  %s2748_s16 = scalar_lea.hbm %s3911_s5, 2048 }
  0x4f   : > { %s252_s14 = sshll.u32 %s2884_s10, 4  ;;  %p2749_p4 = scmp.ne.s32.totalorder %s3911_s5, %s2748_s16  ;;  %s253_s14 = int_to_ptr.vmem [resolvable:$true] %s252_s14 }
  0x50   : > { %p2755_p11 = scmp.lt.u32.totalorder %s2748_s16, %s3911_s5 }
  0x51   : > { %p2751_p5 = pnand %p2749_p4, %p3013_p3 }
  0x53   : > { %p2752_p6 = pneg %p2751_p5 }
  0x55   : > { %p2757_p12 = pnand %p2755_p11, %p2752_p6 }
  0x57   : > { %2760 = shalt.err (!%p2757_p12)
}
  0x58   : > { %s2761_s20 = scalar_lea.vmem %s253_s14, 2048  ;;  %p2769_p8 = scmp.lt.s32.totalorder %s253_s14, %s253_s14 }
  0x59   : > { %p2762_p13 = scmp.ne.s32.totalorder %s253_s14, %s2761_s20  ;;  %p2770_p9 = scmp.lt.s32.totalorder %s2761_s20, %s2761_s20 }
  0x5b   : > { %p2764_p0 = pnand %p2762_p13, %p3013_p3  ;;  %p2771_p10 = por %p2770_p9, %p2769_p8 }
  0x5d   : > { %p2765_p7 = pneg %p2764_p0 }
  0x5f   : > { %p2772_p1 = pnand %p2771_p10, %p2765_p7 }
  0x61   : > { %2775 = shalt.err (!%p2772_p1)
}
  0x62   : > { %2479 = dma.hbm_to_vmem [thread:$0]  (!%p2999_p2), %s3911_s5, 2048, %s253_s14, [#allocation9], %s2882_s22, %s2882_s22, %s2883_s29  }
  0x63   : > { %p1932_p4 = scmp.ge.s32.totalorder %s2878_s27, 2 }
  0x64   : > { %p3936_p3 = scmp.ne.s32.totalorder (!%p1932_p4), %s3927_s11, 0 }
  0x65   : > { %265 = sbr.rel (%p1932_p4) target bundleno = 143 (0x8f), region = 40 }
  0x6c   : > { %268 = sbr.rel (!%p3936_p3) target bundleno = 143 (0x8f), region = 44  ;;  %s269_s9 = sand.u32 (%p3936_p3), 1, %s2874_s26  }
  0x6d   : > { %s1934_s30 = sshll.u32 (%p3936_p3), %s2878_s27, 5  ;;  %s1933_s18 = sshll.u32 (%p3936_p3), %s269_s9, 8 }
  0x6e   : > { %s275_s10 = ssub.s32 (%p3936_p3), 40, %s1934_s30  ;;  %s3089_s29 = scalar_lea.sflag (%p3936_p3), [#allocation3], %s269_s9 }
  0x6f   : > { %p276_p5 = scmp.lt.s32.totalorder (%p3936_p3), %s275_s10, 32  ;;  %s273_s14 = scalar_lea.vmem (%p3936_p3), [#allocation2], %s1933_s18 }
  0x73   : > { %s3959_s10 = smov (!%p276_p5, %s275_s10), 32 }
  0x74   : > { %s3086_s23 = sshll.u32 %s3959_s10, 7 }
  0x75   : > { %s280_s22 = ssub.s32 4096, %s3086_s23 }
  0x76   : > { %281 = vsyncadd %s3089_s29, %s280_s22  ;;  %p1936_p2 = scmp.ne.s32.totalorder %s3086_s23, 0  ;;  %s1958_s11 = sshll.u32 %s2878_s27, 12 }
  0x77   : > { %s3097_s19 = scalar_lea.hbm %s3906_s0, %s1958_s11  ;;  %s286_s21 = sshll.u32 %s273_s14, 4  ;;  %s3099_s21 = int_to_ptr.vmem [resolvable:$true] %s286_s21 }
  0x78   : > { %s2776_s17 = scalar_lea.hbm %s3097_s19, %s3086_s23  ;;  %s2780_s24 = scalar_lea.hbm %s3906_s0, 5120 }
  0x79   : > { %p2777_p6 = scmp.ne.s32.totalorder %s3097_s19, %s2776_s17  ;;  %p2781_p13 = scmp.lt.u32.totalorder %s3097_s19, %s3906_s0 }
  0x7a   : > { %p2782_p0 = scmp.lt.u32.totalorder %s2780_s24, %s2776_s17  ;;  %p2784_p8 = scmp.lt.u32.totalorder %s2776_s17, %s3097_s19 }
  0x7b   : > { %p2778_p11 = pnand %p2777_p6, %p1936_p2 }
  0x7c   : > { %p2783_p7 = por %p2782_p0, %p2781_p13 }
  0x7d   : > { %p2779_p12 = pneg %p2778_p11 }
  0x7e   : > { %p2785_p9 = por %p2784_p8, %p2783_p7 }
  0x80   : > { %p2786_p10 = pnand %p2785_p9, %p2779_p12 }
  0x82   : > { %2789 = shalt.err (!%p2786_p10)
}
  0x83   : > { %s2790_s18 = scalar_lea.vmem %s3099_s21, %s3086_s23  ;;  %s2885_s10 = smov [#allocation2]  }
  0x84   : > { %p2791_p1 = scmp.ne.s32.totalorder %s3099_s21, %s2790_s18  ;;  %s2794_s22 = sshll.u32 %s2885_s10, 4  ;;  %s2795_s22 = int_to_ptr.vmem [resolvable:$false] %s2794_s22 }
  0x85   : > { %s2796_s14 = scalar_lea.vmem %s2795_s22, 8192  ;;  %p2797_p6 = scmp.lt.s32.totalorder %s3099_s21, %s2795_s22 }
  0x86   : > { %p2792_p3 = pnand %p2791_p1, %p1936_p2  ;;  %p2798_p11 = scmp.lt.s32.totalorder %s2796_s14, %s2790_s18 }
  0x88   : > { %p2793_p5 = pneg %p2792_p3  ;;  %p2799_p13 = por %p2798_p11, %p2797_p6 }
  0x8a   : > { %p2800_p0 = pnand %p2799_p13, %p2793_p5 }
  0x8c   : > { %2803 = shalt.err (!%p2800_p0)
}
  0x8d   : > { %s2886_s11 = smov 128   ;;  %s2887_s8 = smov 8  }
  0x8e   : > { %292 = dma.hbm_to_vmem [thread:$0]  (%p1936_p2), %s3097_s19, %s3086_s23, %s3099_s21, %s3089_s29, %s2886_s11, %s2886_s11, %s2887_s8  }
  0x8f PF: > { %p3937_p12 = scmp.ne.s32.totalorder %s3932_s15, 0 }
  0x91   : > { %298 = sbr.rel (%p3937_p12) target bundleno = 1007 (0x3ef), region = 48 }
  0x98   : > { %s3129_s16 = sand.u32 1, %s2870_s25   ;;  %p3938_p7 = scmp.ne.s32.totalorder %s3928_s12, 0 }
  0x99   : > { %s1941_s17 = sshll.u32 %s3129_s16, 8  ;;  %s301_s20 = scalar_lea.sflag [#allocation3], %s3129_s16 }
  0x9a   : > { %s3135_s1 = scalar_lea.vmem [#allocation2], %s1941_s17 }
  0x9b   : > { %2849 = dma.done.wait (%p3938_p7), %s301_s20, 4096  }
  0x9c   : > { %2851 = vsyncadd (%p3938_p7), %s301_s20, 4294963200  ;;  %p3939_p2 = scmp.eq.s32.totalorder %s2952_s28, 0 }
  0x9e   : > { %2853 = dma.done.wait (%p3939_p2), [#allocation6], 4096   ;;  %p3940_p8 = pmov %p3939_p2 }
  0x9f   : > { %p3941_p9 = pmov %p3939_p2 }
  0xa0   : > { %2855 = vsyncadd (%p3940_p8), [#allocation6], 4294963200 }
  0xa1   : > { %2857 = dma.done.wait (%p3941_p9), [#allocation9], 2048   ;;  %p3942_p10 = pmov %p3939_p2 }
  0xa2   : > { %v389_v0 = vld [vmem:[#allocation5] sm:$0xff]  ;;  %v390_v1 = vld [vmem:[#allocation5 + $0x8] sm:$0xff]  ;;  %v391_v2 = vld [vmem:[#allocation5 + $0x10] sm:$0xff]  ;;  %s3749_s24 = scalar_lea.vmem [#allocation10], %s1941_s17  ;;  %s1806_s9 = scalar_lea.sflag [#allocation4], %s3129_s16 }
  0xa3   : > { %2859 = vsyncadd (%p3942_p10), [#allocation9], 4294965248  ;;  %v2344_v3 = vpack.c.bf16 %v390_v1, %v389_v0  ;;  %v392_v4 = vld [vmem:[#allocation5 + $0x18] sm:$0xff]  ;;  %v393_v6 = vld [vmem:[#allocation5 + $0x20] sm:$0xff]  ;;  %p3949_p1 = scmp.ne.s32.totalorder %s3929_s13, 0 }
  0xa4   : > { %v2348_v5 = vpack.c.bf16 %v392_v4, %v391_v2  ;;  %v394_v7 = vld [vmem:[#allocation5 + $0x28] sm:$0xff]  ;;  %v357_v9 = vld [vmem:[%s3135_s1] sm:$0xff]  ;;  %v395_v10 = vld [vmem:[#allocation5 + $0x30] sm:$0xff]  ;;  %s1950_s30 = sshll.u32 (%p3949_p1), %s2952_s28, 5 }
  0xa5   : > { %2345 = vmatprep.subr.bf16.mxu0 %v2344_v3  ;;  %2440 = vmatprep.subr.bf16.mxu1 %v2344_v3  ;;  %v2352_v8 = vpack.c.bf16 %v394_v7, %v393_v6  ;;  %v396_v11 = vld [vmem:[#allocation5 + $0x38] sm:$0xff]  ;;  %v373_v12 = vld [vmem:[%s3135_s1 + $0x80] sm:$0xff]  ;;  %v398_v15 = vld [vmem:[#allocation5 + $0x48] sm:$0xff]  ;;  %s1814_s18 = ssub.s32 (%p3949_p1), 40, %s1950_s30 }
  0xa6   : > { %2347 = vmatpush3.bf16.msra.mxu0 %v2344_v3  ;;  %2448 = vmatpush3.bf16.msra.mxu1 %v2344_v3  ;;  %v2356_v13 = vpack.c.bf16 %v396_v11, %v395_v10  ;;  %v397_v14 = vld [vmem:[#allocation5 + $0x40] sm:$0xff]  ;;  %v399_v17 = vld [vmem:[#allocation5 + $0x50] sm:$0xff]  ;;  %v400_v18 = vld [vmem:[#allocation5 + $0x58] sm:$0xff]  ;;  %p1815_p3 = scmp.lt.s32.totalorder (%p3949_p1), %s1814_s18, 32 }
  0xa7   : > { %2349 = vmatprep.subr.bf16.mxu0 %v2348_v5  ;;  %2441 = vmatprep.subr.bf16.mxu1 %v2348_v5  ;;  %v2360_v16 = vpack.c.bf16 %v398_v15, %v397_v14  ;;  %v2364_v19 = vpack.c.bf16 %v400_v18, %v399_v17  ;;  %v401_v20 = vld [vmem:[#allocation5 + $0x60] sm:$0xff]  ;;  %v402_v21 = vld [vmem:[#allocation5 + $0x68] sm:$0xff]  ;;  %v403_v23 = vld [vmem:[#allocation5 + $0x70] sm:$0xff] }
  0xa8   : > { %2136 = vmatprep.mubr.f32.mxu0 %v357_v9  ;;  %2160 = vmatprep.mubr.f32.mxu1 %v373_v12  ;;  %v2368_v22 = vpack.c.bf16 %v402_v21, %v401_v20  ;;  %v404_v24 = vld [vmem:[#allocation5 + $0x78] sm:$0xff]  ;;  %v925_v26 = vld [vmem:[#allocation7] sm:$0xff]  ;;  %v926_v27 = vld [vmem:[#allocation7 + $0x8] sm:$0xff] }
  0xa9   : > { %v2372_v25 = vpack.c.bf16 %v404_v24, %v403_v23  ;;  %v2376_v28 = vpack.c.bf16 %v926_v27, %v925_v26  ;;  %v358_v29 = vld [vmem:[%s3135_s1 + $0x8] sm:$0xff]  ;;  %v359_v31 = vld [vmem:[%s3135_s1 + $0x10] sm:$0xff]  ;;  %v360_v33 = vld [vmem:[%s3135_s1 + $0x18] sm:$0xff] }
  0xaa   : > { %2351 = vmatpush3.bf16.msra.mxu0 %v2348_v5  ;;  %2449 = vmatpush3.bf16.msra.mxu1 %v2348_v5  ;;  %v374_v30 = vld [vmem:[%s3135_s1 + $0x88] sm:$0xff]  ;;  %v375_v32 = vld [vmem:[%s3135_s1 + $0x90] sm:$0xff]  ;;  %v376_v34 = vld [vmem:[%s3135_s1 + $0x98] sm:$0xff] }
  0xab   : > { %2353 = vmatprep.subr.bf16.mxu0 %v2352_v8  ;;  %2442 = vmatprep.subr.bf16.mxu1 %v2352_v8  ;;  %v361_v35 = vld [vmem:[%s3135_s1 + $0x20] sm:$0xff]  ;;  %v362_v37 = vld [vmem:[%s3135_s1 + $0x28] sm:$0xff]  ;;  %v363_v39 = vld [vmem:[%s3135_s1 + $0x30] sm:$0xff] }
  0xac   : > { %v377_v36 = vld [vmem:[%s3135_s1 + $0xa0] sm:$0xff]  ;;  %v378_v38 = vld [vmem:[%s3135_s1 + $0xa8] sm:$0xff]  ;;  %v379_v40 = vld [vmem:[%s3135_s1 + $0xb0] sm:$0xff] }
  0xad   : > { %v364_v41 = vld [vmem:[%s3135_s1 + $0x38] sm:$0xff]  ;;  %v365_v43 = vld [vmem:[%s3135_s1 + $0x40] sm:$0xff]  ;;  %v366_v45 = vld [vmem:[%s3135_s1 + $0x48] sm:$0xff] }
  0xae   : > { %2355 = vmatpush3.bf16.msra.mxu0 %v2352_v8  ;;  %2450 = vmatpush3.bf16.msra.mxu1 %v2352_v8  ;;  %v380_v42 = vld [vmem:[%s3135_s1 + $0xb8] sm:$0xff]  ;;  %v381_v44 = vld [vmem:[%s3135_s1 + $0xc0] sm:$0xff]  ;;  %v382_v46 = vld [vmem:[%s3135_s1 + $0xc8] sm:$0xff] }
  0xaf   : > { %2357 = vmatprep.subr.bf16.mxu0 %v2356_v13  ;;  %2443 = vmatprep.subr.bf16.mxu1 %v2356_v13  ;;  %v367_v47 = vld [vmem:[%s3135_s1 + $0x50] sm:$0xff]  ;;  %v368_v49 = vld [vmem:[%s3135_s1 + $0x58] sm:$0xff]  ;;  %v369_v51 = vld [vmem:[%s3135_s1 + $0x60] sm:$0xff] }
  0xb0   : > { %v383_v48 = vld [vmem:[%s3135_s1 + $0xd0] sm:$0xff]  ;;  %v384_v50 = vld [vmem:[%s3135_s1 + $0xd8] sm:$0xff]  ;;  %v385_v52 = vld [vmem:[%s3135_s1 + $0xe0] sm:$0xff] }
  0xb1   : > { %v370_v53 = vld [vmem:[%s3135_s1 + $0x68] sm:$0xff]  ;;  %v371_v55 = vld [vmem:[%s3135_s1 + $0x70] sm:$0xff]  ;;  %v372_v57 = vld [vmem:[%s3135_s1 + $0x78] sm:$0xff] }
  0xb2   : > { %2359 = vmatpush3.bf16.msra.mxu0 %v2356_v13  ;;  %2451 = vmatpush3.bf16.msra.mxu1 %v2356_v13  ;;  %v386_v54 = vld [vmem:[%s3135_s1 + $0xe8] sm:$0xff]  ;;  %v387_v56 = vld [vmem:[%s3135_s1 + $0xf0] sm:$0xff]  ;;  %v388_v58 = vld [vmem:[%s3135_s1 + $0xf8] sm:$0xff] }
  0xb3   : > { %2361 = vmatprep.subr.bf16.mxu0 %v2360_v16  ;;  %2444 = vmatprep.subr.bf16.mxu1 %v2360_v16  ;;  %v927_v59 = vld [vmem:[#allocation7 + $0x10] sm:$0xff]  ;;  %v928_v60 = vld [vmem:[#allocation7 + $0x18] sm:$0xff]  ;;  %v929_v62 = vld [vmem:[#allocation7 + $0x20] sm:$0xff] }
  0xb4   : > { %v2380_v61 = vpack.c.bf16 %v928_v60, %v927_v59  ;;  %v930_v63 = vld [vmem:[#allocation7 + $0x28] sm:$0xff]  ;;  %v931_v1 = vld [vmem:[#allocation7 + $0x30] sm:$0xff]  ;;  %v932_v2 = vld [vmem:[#allocation7 + $0x38] sm:$0xff] }
  0xb5   : > { %v2384_v0 = vpack.c.bf16 %v930_v63, %v929_v62  ;;  %v2388_v3 = vpack.c.bf16 %v932_v2, %v931_v1  ;;  %v933_v4 = vld [vmem:[#allocation7 + $0x40] sm:$0xff]  ;;  %v934_v5 = vld [vmem:[#allocation7 + $0x48] sm:$0xff]  ;;  %v935_v7 = vld [vmem:[#allocation7 + $0x50] sm:$0xff] }
  0xb6   : > { %2363 = vmatpush3.bf16.msra.mxu0 %v2360_v16  ;;  %2452 = vmatpush3.bf16.msra.mxu1 %v2360_v16  ;;  %v2392_v6 = vpack.c.bf16 %v934_v5, %v933_v4  ;;  %v936_v8 = vld [vmem:[#allocation7 + $0x58] sm:$0xff]  ;;  %v937_v10 = vld [vmem:[#allocation7 + $0x60] sm:$0xff]  ;;  %v938_v11 = vld [vmem:[#allocation7 + $0x68] sm:$0xff] }
  0xb7   : > { %2365 = vmatprep.subr.bf16.mxu0 %v2364_v19  ;;  %2445 = vmatprep.subr.bf16.mxu1 %v2364_v19  ;;  %v2396_v9 = vpack.c.bf16 %v936_v8, %v935_v7  ;;  %v2400_v12 = vpack.c.bf16 %v938_v11, %v937_v10  ;;  %v939_v13 = vld [vmem:[#allocation7 + $0x70] sm:$0xff]  ;;  %v940_v14 = vld [vmem:[#allocation7 + $0x78] sm:$0xff]  ;;  %v1461_v16 = vld [vmem:[#allocation8] sm:$0xff] }
  0xb8   : > { %v2404_v15 = vpack.c.bf16 %v940_v14, %v939_v13  ;;  %v1462_v17 = vld [vmem:[#allocation8 + $0x8] sm:$0xff] }
  0xb9   : > { %v2408_v18 = vpack.c.bf16 %v1462_v17, %v1461_v16 }
  0xba   : > { %2367 = vmatpush3.bf16.msra.mxu0 %v2364_v19  ;;  %2453 = vmatpush3.bf16.msra.mxu1 %v2364_v19  ;;  %v3184_v19 = vld [vmem:[%s3908_s2] ss:$0 sm:$0xff] }
  0xbb   : > { %2369 = vmatprep.subr.bf16.mxu0 %v2368_v22  ;;  %2446 = vmatprep.subr.bf16.mxu1 %v2368_v22 }
  0xbe   : > { %2371 = vmatpush3.bf16.msra.mxu0 %v2368_v22  ;;  %2454 = vmatpush3.bf16.msra.mxu1 %v2368_v22 }
  0xbf   : > { %2373 = vmatprep.subr.bf16.mxu0 %v2372_v25  ;;  %2447 = vmatprep.subr.bf16.mxu1 %v2372_v25 }
  0xc2   : > { %2375 = vmatpush3.bf16.msra.mxu0 %v2372_v25  ;;  %2455 = vmatpush3.bf16.msra.mxu1 %v2372_v25 }
  0xc3   : > { %2377 = vmatprep.subr.bf16.mxu1 %v2376_v28  ;;  %2409 = vmatprep.subr.bf16.mxu0 %v2408_v18 }
  0xc5   : > { %2137 = vmatmul.mubr.f32.vlgmr.msra.gmra.mrb[0].mxu0 %v358_v29  ;;  %2161 = vmatmul.mubr.f32.vlgmr.msra.gmra.mrb[0].mxu1 %v374_v30 }
  0xc6   : > { %2139 = vmatprep.mubr.f32.mxu0 %v359_v31  ;;  %2163 = vmatprep.mubr.f32.mxu1 %v375_v32 }
  0xc7   : > { %2379 = vmatpush3.bf16.msra.mxu1 %v2376_v28  ;;  %2411 = vmatpush3.bf16.msra.mxu0 %v2408_v18 }
  0xc8   : > { %2381 = vmatprep.subr.bf16.mxu1 %v2380_v61 }
  0xc9   : > { %2140 = vmatmul.mubr.f32.gmra.mrb[2].mxu0 %v360_v33  ;;  %2164 = vmatmul.mubr.f32.gmra.mrb[2].mxu1 %v376_v34 }
  0xca   : > { %2142 = vmatprep.mubr.f32.mxu0 %v361_v35  ;;  %2166 = vmatprep.mubr.f32.mxu1 %v377_v36 }
  0xcb   : > { %2383 = vmatpush3.bf16.msra.mxu1 %v2380_v61 }
  0xcc   : > { %2385 = vmatprep.subr.bf16.mxu1 %v2384_v0 }
  0xcd   : > { %2143 = vmatmul.mubr.f32.gmra.mrb[4].mxu0 %v362_v37  ;;  %2167 = vmatmul.mubr.f32.gmra.mrb[4].mxu1 %v378_v38 }
  0xce   : > { %2145 = vmatprep.mubr.f32.mxu0 %v363_v39  ;;  %2169 = vmatprep.mubr.f32.mxu1 %v379_v40 }
  0xcf   : > { %2387 = vmatpush3.bf16.msra.mxu1 %v2384_v0 }
  0xd0   : > { %2389 = vmatprep.subr.bf16.mxu1 %v2388_v3 }
  0xd1   : > { %2146 = vmatmul.mubr.f32.gmra.mrb[6].mxu0 %v364_v41  ;;  %2170 = vmatmul.mubr.f32.gmra.mrb[6].mxu1 %v380_v42 }
  0xd2   : > { %2148 = vmatprep.mubr.f32.mxu0 %v365_v43  ;;  %2172 = vmatprep.mubr.f32.mxu1 %v381_v44 }
  0xd3   : > { %2391 = vmatpush3.bf16.msra.mxu1 %v2388_v3 }
  0xd4   : > { %2393 = vmatprep.subr.bf16.mxu1 %v2392_v6 }
  0xd5   : > { %2149 = vmatmul.mubr.f32.gmra.mrb[8].mxu0 %v366_v45  ;;  %2173 = vmatmul.mubr.f32.gmra.mrb[8].mxu1 %v382_v46 }
  0xd6   : > { %2151 = vmatprep.mubr.f32.mxu0 %v367_v47  ;;  %2175 = vmatprep.mubr.f32.mxu1 %v383_v48 }
  0xd7   : > { %2395 = vmatpush3.bf16.msra.mxu1 %v2392_v6 }
  0xd8   : > { %2397 = vmatprep.subr.bf16.mxu1 %v2396_v9 }
  0xd9   : > { %2152 = vmatmul.mubr.f32.gmra.mrb[10].mxu0 %v368_v49  ;;  %2176 = vmatmul.mubr.f32.gmra.mrb[10].mxu1 %v384_v50 }
  0xda   : > { %2154 = vmatprep.mubr.f32.mxu0 %v369_v51  ;;  %2178 = vmatprep.mubr.f32.mxu1 %v385_v52 }
  0xdb   : > { %2399 = vmatpush3.bf16.msra.mxu1 %v2396_v9 }
  0xdc   : > { %2401 = vmatprep.subr.bf16.mxu1 %v2400_v12 }
  0xdd   : > { %2155 = vmatmul.mubr.f32.gmra.mrb[12].mxu0 %v370_v53  ;;  %2179 = vmatmul.mubr.f32.gmra.mrb[12].mxu1 %v386_v54 }
  0xde   : > { %2157 = vmatprep.mubr.f32.mxu0 %v371_v55  ;;  %2181 = vmatprep.mubr.f32.mxu1 %v387_v56 }
  0xdf   : > { %2403 = vmatpush3.bf16.msra.mxu1 %v2400_v12 }
  0xe0   : > { %2405 = vmatprep.subr.bf16.mxu1 %v2404_v15 }
  0xe1   : > { %2158 = vmatmul.mubr.f32.gmra.mrb[14].mxu0 %v372_v57  ;;  %2182 = vmatmul.mubr.f32.gmra.mrb[14].mxu1 %v388_v58 }
  0xe3   : > { %2407 = vmatpush3.bf16.msra.mxu1 %v2404_v15 }
 0x198   : > { %v2138_v20 = vpop.f32.mrb[0].mxu0  ;;  %v2162_v21 = vpop.f32.mrb[0].mxu1 }
 0x199   : > { %v484_v22 = vadd.f32 %v2138_v20, %v3184_v19  ;;  %v478_v23 = vpop.f32.mrb[1].mxu0  ;;  %v558_v24 = vpop.f32.mrb[1].mxu1  ;;  %v3192_v33 = vadd.f32 %v2162_v21, %v3184_v19 }
 0x19a   : > { %v479_v25 = vadd.f32 %v3184_v19, %v478_v23  ;;  %v3189_v29 = vadd.f32 %v3184_v19, %v558_v24 }
 0x19b   : > { %v670_v26 = vmul.f32 0.044715, %v484_v22  ;;  %v686_v46 = vmul.f32 0.044715, %v3192_v33  ;;  %v3212_v51 = vmul.f32 0.5, %v484_v22  ;;  %v3216_v54 = vmul.f32 0.5, %v3192_v33 }
 0x19c   : > { %v669_v27 = vmul.f32 0.044715, %v479_v25  ;;  %v2141_v28 = vpop.f32.mrb[2].mxu0  ;;  %v2165_v30 = vpop.f32.mrb[2].mxu1  ;;  %v685_v40 = vmul.f32 0.044715, %v3189_v29 }
 0x19d   : > { %v702_v31 = vmul.f32 %v670_v26, %v484_v22  ;;  %v488_v32 = vpop.f32.mrb[3].mxu0  ;;  %v568_v34 = vpop.f32.mrb[3].mxu1  ;;  %v3198_v38 = vadd.f32 %v2141_v28, %v3184_v19  ;;  %v3204_v47 = vadd.f32 %v2165_v30, %v3184_v19  ;;  %3943 = vst [vmem:[#allocation19_spill] sm:$0xff] %v3216_v54  ;;  %v3225_v62 = vmul.f32 %v686_v46, %v3192_v33 }
 0x19e   : > { %v701_v35 = vmul.f32 %v669_v27, %v479_v25  ;;  %v3195_v36 = vadd.f32 %v3184_v19, %v488_v32  ;;  %v3210_v50 = vadd.f32 %v3184_v19, %v568_v34  ;;  %v717_v57 = vmul.f32 %v685_v40, %v3189_v29 }
 0x19f   : > { %v734_v37 = vmul.f32 %v702_v31, %v484_v22  ;;  %v672_v52 = vmul.f32 0.044715, %v3198_v38  ;;  %v688_v0 = vmul.f32 0.044715, %v3204_v47  ;;  %v3235_v5 = vmul.f32 0.5, %v479_v25 }
 0x1a0   : > { %v2144_v39 = vpop.f32.mrb[4].mxu0  ;;  %v2168_v41 = vpop.f32.mrb[4].mxu1  ;;  %v733_v42 = vmul.f32 %v701_v35, %v479_v25  ;;  %v671_v44 = vmul.f32 0.044715, %v3195_v36  ;;  %v687_v2 = vmul.f32 0.044715, %v3210_v50  ;;  %v3249_v14 = vmul.f32 %v717_v57, %v3189_v29 }
 0x1a1   : > { %v766_v43 = vadd.f32 %v734_v37, %v484_v22  ;;  %v498_v45 = vpop.f32.mrb[5].mxu0  ;;  %v578_v48 = vpop.f32.mrb[5].mxu1  ;;  %v3222_v61 = vadd.f32 %v2144_v39, %v3184_v19  ;;  %v3230_v3 = vadd.f32 %v2168_v41, %v3184_v19  ;;  %v704_v6 = vmul.f32 %v672_v52, %v3198_v38 }
 0x1a2   : > { %v3207_v49 = vadd.f32 %v3184_v19, %v498_v45  ;;  %v765_v53 = vadd.f32 %v733_v42, %v479_v25  ;;  %v703_v60 = vmul.f32 %v671_v44, %v3195_v36  ;;  %v3233_v4 = vadd.f32 %v3184_v19, %v578_v48 }
 0x1a3   : > { %v798_v55 = vmul.f32 0.7978846, %v766_v43  ;;  %v674_v15 = vmul.f32 0.044715, %v3222_v61  ;;  %v3253_v16 = vmul.f32 %v688_v0, %v3204_v47  ;;  %v690_v23 = vmul.f32 0.044715, %v3230_v3 }
 0x1a4   : > { %v673_v56 = vmul.f32 0.044715, %v3207_v49  ;;  %v2147_v58 = vpop.f32.mrb[6].mxu0  ;;  %v2171_v59 = vpop.f32.mrb[6].mxu1  ;;  %v797_v9 = vmul.f32 0.7978846, %v765_v53  ;;  %v735_v21 = vmul.f32 %v703_v60, %v3195_v36  ;;  %v736_v28 = vmul.f32 %v704_v6, %v3198_v38 }
 0x1a5   : > { %v508_v63 = vpop.f32.mrb[7].mxu0  ;;  %v588_v1 = vpop.f32.mrb[7].mxu1  ;;  %v3239_v7 = vadd.f32 %v2147_v58, %v3184_v19  ;;  %2532 = vtanh.f32 %v798_v55  ;;  %v3246_v12 = vadd.f32 %v2171_v59, %v3184_v19  ;;  %v689_v24 = vmul.f32 0.044715, %v3233_v4 }
 0x1a6   : > { %v3242_v8 = vadd.f32 %v3184_v19, %v508_v63  ;;  %v705_v10 = vmul.f32 %v673_v56, %v3207_v49  ;;  %v3256_v18 = vadd.f32 %v3184_v19, %v588_v1  ;;  %2534 = vtanh.f32 %v797_v9 }
 0x1a7   : > { %v676_v26 = vmul.f32 0.044715, %v3239_v7  ;;  %v3271_v30 = vmul.f32 %v687_v2, %v3210_v50  ;;  %v692_v34 = vmul.f32 0.044715, %v3246_v12  ;;  %v706_v39 = vmul.f32 %v674_v15, %v3222_v61 }
 0x1a8   : > { %v2150_v11 = vpop.f32.mrb[8].mxu0  ;;  %v2174_v13 = vpop.f32.mrb[8].mxu1  ;;  %v675_v27 = vmul.f32 0.044715, %v3242_v8  ;;  %v737_v37 = vmul.f32 %v705_v10, %v3207_v49  ;;  %v691_v41 = vmul.f32 0.044715, %v3256_v18  ;;  %v767_v44 = vadd.f32 %v735_v21, %v3195_v36 }
 0x1a9   : > { %v518_v17 = vpop.f32.mrb[9].mxu0  ;;  %v598_v20 = vpop.f32.mrb[9].mxu1  ;;  %v3260_v22 = vadd.f32 %v2150_v11, %v3184_v19  ;;  %v3265_v25 = vadd.f32 %v2174_v13, %v3184_v19  ;;  %v3286_v46 = vmul.f32 %v690_v23, %v3230_v3  ;;  %v3289_v48 = vmul.f32 %v689_v24, %v3233_v4 }
 0x1aa   : > { %v3274_v31 = vadd.f32 %v3184_v19, %v518_v17  ;;  %v3281_v42 = vadd.f32 %v3184_v19, %v598_v20  ;;  %v3293_v53 = vmul.f32 %v676_v26, %v3239_v7  ;;  %v707_v55 = vmul.f32 %v675_v27, %v3242_v8 }
 0x1ab   : > { %v678_v45 = vmul.f32 0.044715, %v3260_v22  ;;  %v694_v52 = vmul.f32 0.044715, %v3265_v25  ;;  %v768_v57 = vadd.f32 %v736_v28, %v3198_v38  ;;  %v3302_v59 = vmul.f32 %v692_v34, %v3246_v12 }
 0x1ac   : > { %v2153_v32 = vpop.f32.mrb[10].mxu0  ;;  %v2177_v35 = vpop.f32.mrb[10].mxu1  ;;  %v677_v58 = vmul.f32 0.044715, %v3274_v31  ;;  %v769_v0 = vadd.f32 %v737_v37, %v3207_v49  ;;  %v3309_v1 = vmul.f32 %v691_v41, %v3256_v18  ;;  %v693_v6 = vmul.f32 0.044715, %v3281_v42 }
 0x1ad   : > { %v528_v40 = vpop.f32.mrb[11].mxu0  ;;  %v608_v43 = vpop.f32.mrb[11].mxu1  ;;  %v3297_v56 = vadd.f32 %v2153_v32, %v3184_v19  ;;  %v3305_v63 = vadd.f32 %v2177_v35, %v3184_v19  ;;  %v799_v9 = vmul.f32 0.7978846, %v767_v44  ;;  %v738_v11 = vmul.f32 %v706_v39, %v3222_v61 }
 0x1ae   : > { %v710_v15 = vmul.f32 %v678_v45, %v3260_v22  ;;  %v3315_v17 = vadd.f32 %v3184_v19, %v528_v40  ;;  %v3318_v20 = vmul.f32 %v694_v52, %v3265_v25  ;;  %v3321_v21 = vadd.f32 %v3184_v19, %v608_v43 }
 0x1af   : > { %3944 = vst [vmem:[#allocation20_spill] sm:$0xff] %v3305_v63  ;;  %v2533_v13 = vpop.eup %2532  ;;  %v680_v24 = vmul.f32 0.044715, %v3297_v56  ;;  %2536 = vtanh.f32 %v799_v9  ;;  %v800_v27 = vmul.f32 0.7978846, %v768_v57  ;;  %v709_v28 = vmul.f32 %v677_v58, %v3274_v31 }
 0x1b0   : > { %v2156_v60 = vpop.f32.mrb[12].mxu0  ;;  %v2180_v10 = vpop.f32.mrb[12].mxu1  ;;  %v696_v35 = vmul.f32 0.044715, %v3305_v63  ;;  %v801_v37 = vmul.f32 0.7978846, %v769_v0  ;;  %v3338_v57 = vmul.f32 %v693_v6, %v3281_v42  ;;  %v770_v54 = vadd.f32 %v738_v11, %v3222_v61 }
 0x1b1   : > { %v538_v2 = vpop.f32.mrb[13].mxu0  ;;  %v618_v23 = vpop.f32.mrb[13].mxu1  ;;  %v3325_v26 = vadd.f32 %v2180_v10, %v3184_v19  ;;  %v3329_v32 = vadd.f32 %v2156_v60, %v3184_v19  ;;  %v862_v43 = vadd.f32 1.0, %v2533_v13  ;;  %v639_v44 = vmul.f32 0.5, %v3195_v36 }
 0x1b2   : > { %v2535_v39 = vpop.eup %2534  ;;  %v3333_v40 = vadd.f32 %v3184_v19, %v538_v2  ;;  %2538 = vtanh.f32 %v800_v27  ;;  %v679_v52 = vmul.f32 0.044715, %v3315_v17  ;;  %v695_v60 = vmul.f32 0.044715, %v3321_v21 }
 0x1b3   : > { %v861_v58 = vadd.f32 1.0, %v2535_v39  ;;  %v640_v2 = vmul.f32 0.5, %v3198_v38  ;;  %2540 = vtanh.f32 %v801_v37  ;;  %v712_v36 = vmul.f32 %v680_v24, %v3297_v56 }
 0x1b4   : > { %v2159_v34 = vpop.f32.mrb[14].mxu0  ;;  %v2183_v45 = vpop.f32.mrb[14].mxu1  ;;  %v682_v13 = vmul.f32 0.044715, %v3329_v32  ;;  %v3352_v27 = vmul.f32 %v696_v35, %v3305_v63  ;;  %v681_v39 = vmul.f32 0.044715, %v3333_v40  ;;  %v711_v37 = vmul.f32 %v679_v52, %v3315_v17 }
 0x1b5   : > { %v548_v41 = vpop.f32.mrb[15].mxu0  ;;  %v628_v9 = vpop.f32.mrb[15].mxu1  ;;  %v3346_v10 = vadd.f32 %v2183_v45, %v3184_v19  ;;  %v893_v6 = vmul.f32 %v861_v58, %v3235_v5  ;;  %v3362_v24 = vadd.f32 %v2159_v34, %v3184_v19  ;;  %v3365_v5 = vmul.f32 %v695_v60, %v3321_v21 }
 0x1b6   : > { %v3342_v0 = vadd.f32 %v3184_v19, %v548_v41  ;;  %3945 = vst [vmem:[#allocation21_spill] sm:$0xff] %v3352_v27  ;;  %v894_v41 = vmul.f32 %v862_v43, %v3212_v51  ;;  %v3358_v38 = vadd.f32 %v3184_v19, %v628_v9  ;;  %v739_v35 = vmul.f32 %v707_v55, %v3242_v8 }
 0x1b7   : > { %2216 = vmatprep.mubr.f32.mxu1 %v893_v6  ;;  %v3370_v51 = vadd.f32 %v3184_v19, %v618_v23  ;;  %v802_v11 = vmul.f32 0.7978846, %v770_v54  ;;  %v740_v43 = vmul.f32 %v3293_v53, %v3239_v7  ;;  %v714_v52 = vmul.f32 %v682_v13, %v3329_v32 }
 0x1b8   : > { %v683_v45 = vmul.f32 0.044715, %v3342_v0  ;;  %2217 = vmatmul.mubr.f32.vlgmr.msra.gmra.mrb[16].mxu1 %v894_v41  ;;  %v641_v34 = vmul.f32 0.5, %v3207_v49  ;;  %v771_v58 = vadd.f32 %v739_v35, %v3242_v8  ;;  %v741_v60 = vmul.f32 %v709_v28, %v3274_v31 }
 0x1b9   : > { %v2537_v9 = vpop.eup %2536  ;;  %v713_v55 = vmul.f32 %v681_v39, %v3333_v40  ;;  %2542 = vtanh.f32 %v802_v11  ;;  %v772_v6 = vadd.f32 %v740_v43, %v3239_v7  ;;  %v742_v19 = vmul.f32 %v710_v15, %v3260_v22 }
 0x1ba   : > { %v684_v54 = vmul.f32 0.044715, %v3362_v24  ;;  %v863_v23 = vadd.f32 1.0, %v2537_v9  ;;  %v803_v53 = vmul.f32 0.7978846, %v771_v58  ;;  %v773_v13 = vadd.f32 %v741_v60, %v3274_v31 }
 0x1bb   : > { %v715_v49 = vmul.f32 %v683_v45, %v3342_v0  ;;  %v804_v35 = vmul.f32 0.7978846, %v772_v6  ;;  %v774_v28 = vadd.f32 %v742_v19, %v3260_v22  ;;  %v743_v27 = vmul.f32 %v711_v37, %v3315_v17 }
 0x1bc   : > { %v2539_v41 = vpop.eup %2538  ;;  %v895_v39 = vmul.f32 %v863_v23, %v639_v44  ;;  %2544 = vtanh.f32 %v803_v53  ;;  %v805_v43 = vmul.f32 0.7978846, %v773_v13  ;;  %v744_v58 = vmul.f32 %v712_v36, %v3297_v56 }
 0x1bd   : > { %v864_v11 = vadd.f32 1.0, %v2539_v41  ;;  %v2541_v63 = vpop.eup %2540  ;;  %2546 = vtanh.f32 %v804_v35  ;;  %v806_v15 = vmul.f32 0.7978846, %v774_v28  ;;  %v775_v9 = vadd.f32 %v743_v27, %v3315_v17 }
 0x1be   : > { %v716_v60 = vmul.f32 %v684_v54, %v3362_v24  ;;  %2219 = vmatprep.mubr.f32.mxu1 %v895_v39  ;;  %v865_v6 = vadd.f32 1.0, %v2541_v63  ;;  %2548 = vtanh.f32 %v805_v43  ;;  %v776_v44 = vadd.f32 %v744_v58, %v3297_v56 }
 0x1bf   : > { %v896_v45 = vmul.f32 %v864_v11, %v640_v2  ;;  %2550 = vtanh.f32 %v806_v15  ;;  %v807_v19 = vmul.f32 0.7978846, %v775_v9  ;;  %v745_v37 = vmul.f32 %v713_v55, %v3333_v40 }
 0x1c0   : > { %v3392_v23 = vmul.f32 0.044715, %v3325_v26  ;;  %v3395_v27 = vmul.f32 0.044715, %v3370_v51  ;;  %v897_v36 = vmul.f32 %v865_v6, %v641_v34  ;;  %v746_v54 = vmul.f32 %v714_v52, %v3329_v32 }
 0x1c1   : > { %2220 = vmatmul.mubr.f32.gmra.mrb[18].mxu1 %v896_v45  ;;  %2552 = vtanh.f32 %v807_v19  ;;  %v808_v2 = vmul.f32 0.7978846, %v776_v44  ;;  %v777_v63 = vadd.f32 %v745_v37, %v3333_v40  ;;  %v747_v53 = vmul.f32 %v715_v49, %v3342_v0 }
 0x1c2   : > { %2222 = vmatprep.mubr.f32.mxu1 %v897_v36  ;;  %v3401_v13 = vmul.f32 0.044715, %v3346_v10  ;;  %v642_v55 = vmul.f32 0.5, %v3222_v61  ;;  %v778_v41 = vadd.f32 %v746_v54, %v3329_v32  ;;  %v748_v35 = vmul.f32 %v716_v60, %v3362_v24 }
 0x1c3   : > { %v2543_v28 = vpop.eup %2542  ;;  %2554 = vtanh.f32 %v808_v2  ;;  %v809_v34 = vmul.f32 0.7978846, %v777_v63  ;;  %v779_v52 = vadd.f32 %v747_v53, %v3342_v0  ;;  %v781_v39 = vadd.f32 %v3249_v14, %v3189_v29 }
 0x1c4   : > { %v866_v11 = vadd.f32 1.0, %v2543_v28  ;;  %v810_v49 = vmul.f32 0.7978846, %v778_v41  ;;  %v780_v43 = vadd.f32 %v748_v35, %v3362_v24  ;;  %v750_v15 = vmul.f32 %v3225_v62, %v3192_v33 }
 0x1c5   : > { %v643_v61 = vmul.f32 0.5, %v3242_v8  ;;  %2556 = vtanh.f32 %v809_v34  ;;  %v811_v9 = vmul.f32 0.7978846, %v779_v52  ;;  %v813_v58 = vmul.f32 0.7978846, %v781_v39 }
 0x1c6   : > { %v2545_v60 = vpop.eup %2544  ;;  %v898_v45 = vmul.f32 %v866_v11, %v642_v55  ;;  %2558 = vtanh.f32 %v810_v49  ;;  %v812_v6 = vmul.f32 0.7978846, %v780_v43  ;;  %v782_v19 = vadd.f32 %v750_v15, %v3192_v33 }
 0x1c7   : > { %v2547_v44 = vpop.eup %2546  ;;  %v867_v14 = vadd.f32 1.0, %v2545_v60  ;;  %v644_v37 = vmul.f32 0.5, %v3239_v7  ;;  %2560 = vtanh.f32 %v811_v9  ;;  %v751_v36 = vmul.f32 %v3271_v30, %v3210_v50 }
 0x1c8   : > { %v2549_v62 = vpop.eup %2548  ;;  %2223 = vmatmul.mubr.f32.gmra.mrb[20].mxu1 %v898_v45  ;;  %v868_v8 = vadd.f32 1.0, %v2547_v44  ;;  %v645_v54 = vmul.f32 0.5, %v3274_v31  ;;  %2562 = vtanh.f32 %v812_v6  ;;  %v752_v2 = vmul.f32 %v3253_v16, %v3204_v47 }
 0x1c9   : > { %v2551_v63 = vpop.eup %2550  ;;  %v899_v53 = vmul.f32 %v867_v14, %v643_v61  ;;  %v869_v33 = vadd.f32 1.0, %v2549_v62  ;;  %v814_v55 = vmul.f32 0.7978846, %v782_v19  ;;  %v783_v41 = vadd.f32 %v751_v36, %v3210_v50 }
 0x1ca   : > { %v900_v7 = vmul.f32 %v868_v8, %v644_v37  ;;  %v870_v35 = vadd.f32 1.0, %v2551_v63  ;;  %2564 = vtanh.f32 %v813_v58  ;;  %v784_v30 = vadd.f32 %v752_v2, %v3204_v47 }
 0x1cb   : > { %v2553_v28 = vpop.eup %2552  ;;  %2225 = vmatprep.mubr.f32.mxu1 %v899_v53  ;;  %v901_v34 = vmul.f32 %v869_v33, %v645_v54  ;;  %v646_v31 = vmul.f32 0.5, %v3260_v22  ;;  %v815_v52 = vmul.f32 0.7978846, %v783_v41  ;;  %v753_v16 = vmul.f32 %v3289_v48, %v3233_v4 }
 0x1cc   : > { %2226 = vmatmul.mubr.f32.gmra.mrb[22].mxu1 %v900_v7  ;;  %v647_v39 = vmul.f32 0.5, %v3315_v17  ;;  %v871_v11 = vadd.f32 1.0, %v2553_v28  ;;  %v648_v49 = vmul.f32 0.5, %v3297_v56  ;;  %v816_v43 = vmul.f32 0.7978846, %v784_v30 }
 0x1cd   : > { %v2555_v15 = vpop.eup %2554  ;;  %2228 = vmatprep.mubr.f32.mxu1 %v901_v34  ;;  %v902_v61 = vmul.f32 %v870_v35, %v646_v31  ;;  %2566 = vtanh.f32 %v814_v55  ;;  %v785_v9 = vadd.f32 %v753_v16, %v3233_v4  ;;  %v754_v22 = vmul.f32 %v3286_v46, %v3230_v3 }
 0x1ce   : > { %v903_v58 = vmul.f32 %v871_v11, %v647_v39  ;;  %v872_v60 = vadd.f32 1.0, %v2555_v15  ;;  %2568 = vtanh.f32 %v815_v52  ;;  %v755_v48 = vmul.f32 %v3309_v1, %v3256_v18  ;;  %v3946_v11 = vld [vmem:[#allocation20_spill] sm:$0xff] }
 0x1cf   : > { %v2557_v17 = vpop.eup %2556  ;;  %v649_v45 = vmul.f32 0.5, %v3333_v40  ;;  %v817_v56 = vmul.f32 0.7978846, %v785_v9  ;;  %v786_v6 = vadd.f32 %v754_v22, %v3230_v3  ;;  %v756_v19 = vmul.f32 %v3302_v59, %v3246_v12 }
 0x1d0   : > { %v2559_v44 = vpop.eup %2558  ;;  %2229 = vmatmul.mubr.f32.gmra.mrb[24].mxu1 %v902_v61  ;;  %v904_v14 = vmul.f32 %v872_v60, %v648_v49  ;;  %v873_v37 = vadd.f32 1.0, %v2557_v17  ;;  %2570 = vtanh.f32 %v816_v43  ;;  %v787_v46 = vadd.f32 %v755_v48, %v3256_v18  ;;  %v3947_v49 = vld [vmem:[#allocation21_spill] sm:$0xff] }
 0x1d1   : > { %v2561_v36 = vpop.eup %2560  ;;  %2231 = vmatprep.mubr.f32.mxu1 %v903_v58  ;;  %v874_v62 = vadd.f32 1.0, %v2559_v44  ;;  %2572 = vtanh.f32 %v817_v56  ;;  %v818_v1 = vmul.f32 0.7978846, %v786_v6  ;;  %v788_v40 = vadd.f32 %v756_v19, %v3246_v12 }
 0x1d2   : > { %v2563_v8 = vpop.eup %2562  ;;  %v905_v54 = vmul.f32 %v873_v37, %v649_v45  ;;  %v875_v2 = vadd.f32 1.0, %v2561_v36  ;;  %v819_v63 = vmul.f32 0.7978846, %v787_v46  ;;  %v757_v59 = vmul.f32 %v3338_v57, %v3281_v42 }
 0x1d3   : > { %v730_v53 = vmul.f32 %v3392_v23, %v3325_v26  ;;  %v729_v33 = vmul.f32 %v3395_v27, %v3370_v51  ;;  %v732_v55 = vmul.f32 %v3401_v13, %v3346_v10  ;;  %v651_v41 = vmul.f32 0.5, %v3342_v0 }
 0x1d4   : > { %v2565_v7 = vpop.eup %2564  ;;  %v699_v35 = vmul.f32 0.044715, %v3358_v38  ;;  %2232 = vmatmul.mubr.f32.gmra.mrb[26].mxu1 %v904_v14  ;;  %v650_v30 = vmul.f32 0.5, %v3329_v32  ;;  %v876_v28 = vadd.f32 1.0, %v2563_v8  ;;  %v789_v57 = vadd.f32 %v757_v59, %v3281_v42 }
 0x1d5   : > { %2234 = vmatprep.mubr.f32.mxu1 %v905_v54  ;;  %v907_v34 = vmul.f32 %v875_v2, %v651_v41  ;;  %v652_v23 = vmul.f32 0.5, %v3362_v24  ;;  %2574 = vtanh.f32 %v818_v1  ;;  %v820_v27 = vmul.f32 0.7978846, %v788_v40 }
 0x1d6   : > { %v906_v31 = vmul.f32 %v874_v62, %v650_v30  ;;  %2576 = vtanh.f32 %v819_v63  ;;  %v821_v13 = vmul.f32 0.7978846, %v789_v57  ;;  %v758_v0 = vmul.f32 %v3318_v20, %v3265_v25  ;;  %v3948_v62 = vld [vmem:[#allocation19_spill] sm:$0xff] }
 0x1d7   : > { %v2567_v52 = vpop.eup %2566  ;;  %v653_v16 = vmul.f32 0.5, %v3189_v29  ;;  %v877_v39 = vadd.f32 1.0, %v2565_v7  ;;  %v759_v32 = vmul.f32 %v3365_v5, %v3321_v21  ;;  %v760_v43 = vmul.f32 %v3947_v49, %v3946_v11 }
 0x1d8   : > { %v2569_v15 = vpop.eup %2568  ;;  %v731_v24 = vmul.f32 %v699_v35, %v3358_v38  ;;  %2235 = vmatmul.mubr.f32.gmra.mrb[28].mxu1 %v906_v31  ;;  %v908_v61 = vmul.f32 %v876_v28, %v652_v23  ;;  %v655_v9 = vmul.f32 0.5, %v3210_v50  ;;  %v790_v22 = vadd.f32 %v758_v0, %v3265_v25 }
 0x1d9   : > { %2237 = vmatprep.mubr.f32.mxu1 %v907_v34  ;;  %2578 = vtanh.f32 %v820_v27  ;;  %v791_v29 = vadd.f32 %v759_v32, %v3321_v21  ;;  %v792_v20 = vadd.f32 %v760_v43, %v3946_v11  ;;  %v761_v5 = vmul.f32 %v729_v33, %v3370_v51 }
 0x1da   : > { %v2571_v58 = vpop.eup %2570  ;;  %v878_v60 = vadd.f32 1.0, %v2567_v52  ;;  %2580 = vtanh.f32 %v821_v13  ;;  %v822_v48 = vmul.f32 0.7978846, %v790_v22  ;;  %v762_v17 = vmul.f32 %v730_v53, %v3325_v26 }
 0x1db   : > { %v2573_v45 = vpop.eup %2572  ;;  %v909_v56 = vmul.f32 %v877_v39, %v653_v16  ;;  %v879_v6 = vadd.f32 1.0, %v2569_v15  ;;  %v823_v50 = vmul.f32 0.7978846, %v791_v29  ;;  %v793_v19 = vadd.f32 %v761_v5, %v3370_v51 }
 0x1dc   : > { %2238 = vmatmul.mubr.f32.gmra.mrb[30].mxu1 %v908_v61  ;;  %v656_v44 = vmul.f32 0.5, %v3204_v47  ;;  %v657_v14 = vmul.f32 0.5, %v3233_v4  ;;  %2582 = vtanh.f32 %v822_v48  ;;  %v824_v37 = vmul.f32 0.7978846, %v792_v20 }
 0x1dd   : > { %2240 = vmatprep.mubr.f32.mxu1 %v909_v56  ;;  %v794_v46 = vadd.f32 %v762_v17, %v3325_v26  ;;  %v763_v36 = vmul.f32 %v731_v24, %v3358_v38  ;;  %v910_v1 = vmul.f32 %v878_v60, %v3948_v62  ;;  %v880_v40 = vadd.f32 1.0, %v2571_v58  ;;  %v1466_v62 = vld [vmem:[#allocation8 + $0x28] sm:$0xff] }
 0x1de   : > { %2584 = vtanh.f32 %v823_v50  ;;  %v825_v8 = vmul.f32 0.7978846, %v793_v19  ;;  %v911_v2 = vmul.f32 %v879_v6, %v655_v9  ;;  %v881_v63 = vadd.f32 1.0, %v2573_v45 }
 0x1df   : > { %v2575_v54 = vpop.eup %2574  ;;  %v795_v59 = vadd.f32 %v763_v36, %v3358_v38  ;;  %v764_v47 = vmul.f32 %v732_v55, %v3346_v10  ;;  %v658_v53 = vmul.f32 0.5, %v3230_v3  ;;  %2586 = vtanh.f32 %v824_v37  ;;  %v1463_v37 = vld [vmem:[#allocation8 + $0x10] sm:$0xff]  ;;  %v1465_v36 = vld [vmem:[#allocation8 + $0x20] sm:$0xff] }
 0x1e0   : > { %v2577_v4 = vpop.eup %2576  ;;  %2241 = vmatmul.mubr.f32.gmra.mrb[32].mxu1 %v910_v1  ;;  %v826_v33 = vmul.f32 0.7978846, %v794_v46  ;;  %v912_v7 = vmul.f32 %v880_v40, %v656_v44  ;;  %v882_v35 = vadd.f32 1.0, %v2575_v54  ;;  %2588 = vtanh.f32 %v825_v8  ;;  %v1464_v46 = vld [vmem:[#allocation8 + $0x18] sm:$0xff]  ;;  %v1470_v54 = vld [vmem:[#allocation8 + $0x48] sm:$0xff] }
 0x1e1   : > { %2243 = vmatprep.mubr.f32.mxu1 %v911_v2  ;;  %v796_v41 = vadd.f32 %v764_v47, %v3346_v10  ;;  %v827_v30 = vmul.f32 0.7978846, %v795_v59  ;;  %v913_v57 = vmul.f32 %v881_v63, %v657_v14  ;;  %v659_v34 = vmul.f32 0.5, %v3256_v18  ;;  %v1468_v40 = vld [vmem:[#allocation8 + $0x38] sm:$0xff]  ;;  %v1471_v63 = vld [vmem:[#allocation8 + $0x50] sm:$0xff] }
 0x1e2   : > { %v883_v23 = vadd.f32 1.0, %v2577_v4  ;;  %2590 = vtanh.f32 %v826_v33  ;;  %v914_v31 = vmul.f32 %v882_v35, %v658_v53  ;;  %v660_v3 = vmul.f32 0.5, %v3246_v12  ;;  %v1472_v59 = vld [vmem:[#allocation8 + $0x58] sm:$0xff]  ;;  %v1473_v4 = vld [vmem:[#allocation8 + $0x60] sm:$0xff]  ;;  %v1474_v53 = vld [vmem:[#allocation8 + $0x68] sm:$0xff] }
 0x1e3   : > { %v2579_v28 = vpop.eup %2578  ;;  %v828_v55 = vmul.f32 0.7978846, %v796_v41  ;;  %2592 = vtanh.f32 %v827_v30  ;;  %v661_v16 = vmul.f32 0.5, %v3281_v42  ;;  %v662_v49 = vmul.f32 0.5, %v3265_v25  ;;  %v1475_v41 = vld [vmem:[#allocation8 + $0x70] sm:$0xff] }
 0x1e4   : > { %v2581_v27 = vpop.eup %2580  ;;  %2244 = vmatmul.mubr.f32.gmra.mrb[34].mxu1 %v912_v7  ;;  %v884_v13 = vadd.f32 1.0, %v2579_v28  ;;  %v915_v52 = vmul.f32 %v883_v23, %v659_v34  ;;  %v663_v61 = vmul.f32 0.5, %v3321_v21  ;;  %v664_v42 = vmul.f32 0.5, %v3946_v11  ;;  %v1476_v7 = vld [vmem:[#allocation8 + $0x78] sm:$0xff]  ;;  %v3488_v30 = vld [vmem:[%s3910_s4] ss:$0 sm:$0xff] }
 0x1e5   : > { %2246 = vmatprep.mubr.f32.mxu1 %v913_v57  ;;  %v885_v39 = vadd.f32 1.0, %v2581_v27  ;;  %2594 = vtanh.f32 %v828_v55  ;;  %v665_v58 = vmul.f32 0.5, %v3370_v51  ;;  %v666_v17 = vmul.f32 0.5, %v3325_v26 }
 0x1e6   : > { %v2583_v0 = vpop.eup %2582  ;;  %v916_v18 = vmul.f32 %v884_v13, %v660_v3  ;;  %v667_v6 = vmul.f32 0.5, %v3358_v38  ;;  %v668_v19 = vmul.f32 0.5, %v3346_v10  ;;  %v2412_v26 = vpack.c.bf16 %v1464_v46, %v1463_v37  ;;  %v1467_v38 = vld [vmem:[#allocation8 + $0x30] sm:$0xff]  ;;  %v1469_v10 = vld [vmem:[#allocation8 + $0x40] sm:$0xff] }
 0x1e7   : > { %v886_v43 = vadd.f32 1.0, %v2583_v0  ;;  %v917_v24 = vmul.f32 %v885_v39, %v661_v16  ;;  %v2416_v1 = vpack.c.bf16 %v1466_v62, %v1465_v36  ;;  %v2420_v8 = vpack.c.bf16 %v1468_v40, %v1467_v38 }
 0x1e8   : > { %v2585_v32 = vpop.eup %2584  ;;  %2247 = vmatmul.mubr.f32.gmra.mrb[36].mxu1 %v914_v31  ;;  %2413 = vmatprep.subr.bf16.mxu0 %v2412_v26  ;;  %v2424_v2 = vpack.c.bf16 %v1470_v54, %v1469_v10  ;;  %v2428_v47 = vpack.c.bf16 %v1472_v59, %v1471_v63  ;;  %v2432_v33 = vpack.c.bf16 %v1474_v53, %v1473_v4 }
 0x1e9   : > { %2249 = vmatprep.mubr.f32.mxu1 %v915_v52  ;;  %v2587_v15 = vpop.eup %2586  ;;  %v887_v12 = vadd.f32 1.0, %v2585_v32  ;;  %v918_v22 = vmul.f32 %v886_v43, %v662_v49  ;;  %2415 = vmatpush3.bf16.msra.mxu0 %v2412_v26  ;;  %v2436_v35 = vpack.c.bf16 %v1476_v7, %v1475_v41 }
 0x1ea   : > { %v2589_v9 = vpop.eup %2588  ;;  %v888_v29 = vadd.f32 1.0, %v2587_v15  ;;  %2417 = vmatprep.subr.bf16.mxu0 %v2416_v1 }
 0x1eb   : > { %v919_v5 = vmul.f32 %v887_v12, %v663_v61  ;;  %v889_v60 = vadd.f32 1.0, %v2589_v9 }
 0x1ec   : > { %2250 = vmatmul.mubr.f32.gmra.mrb[38].mxu1 %v916_v18  ;;  %v2591_v20 = vpop.eup %2590  ;;  %v920_v25 = vmul.f32 %v888_v29, %v664_v42 }
 0x1ed   : > { %2252 = vmatprep.mubr.f32.mxu1 %v917_v24  ;;  %v2593_v48 = vpop.eup %2592  ;;  %v890_v21 = vadd.f32 1.0, %v2591_v20  ;;  %v921_v56 = vmul.f32 %v889_v60, %v665_v58  ;;  %2419 = vmatpush3.bf16.msra.mxu0 %v2416_v1 }
 0x1ee   : > { %v891_v50 = vadd.f32 1.0, %v2593_v48  ;;  %2421 = vmatprep.subr.bf16.mxu0 %v2420_v8 }
 0x1ef   : > { %v2595_v45 = vpop.eup %2594  ;;  %v922_v11 = vmul.f32 %v890_v21, %v666_v17 }
 0x1f0   : > { %2253 = vmatmul.mubr.f32.gmra.mrb[40].mxu1 %v918_v22  ;;  %v892_v44 = vadd.f32 1.0, %v2595_v45  ;;  %v923_v51 = vmul.f32 %v891_v50, %v667_v6 }
 0x1f1   : > { %2255 = vmatprep.mubr.f32.mxu1 %v919_v5  ;;  %2423 = vmatpush3.bf16.msra.mxu0 %v2420_v8 }
 0x1f2   : > { %v924_v14 = vmul.f32 %v892_v44, %v668_v19  ;;  %2425 = vmatprep.subr.bf16.mxu0 %v2424_v2 }
 0x1f4   : > { %2256 = vmatmul.mubr.f32.gmra.mrb[42].mxu1 %v920_v25 }
 0x1f5   : > { %2258 = vmatprep.mubr.f32.mxu1 %v921_v56  ;;  %2427 = vmatpush3.bf16.msra.mxu0 %v2424_v2 }
 0x1f6   : > { %2429 = vmatprep.subr.bf16.mxu0 %v2428_v47 }
 0x1f8   : > { %2259 = vmatmul.mubr.f32.gmra.mrb[44].mxu1 %v922_v11 }
 0x1f9   : > { %2261 = vmatprep.mubr.f32.mxu1 %v923_v51  ;;  %2431 = vmatpush3.bf16.msra.mxu0 %v2428_v47 }
 0x1fa   : > { %2433 = vmatprep.subr.bf16.mxu0 %v2432_v33 }
 0x1fc   : > { %2262 = vmatmul.mubr.f32.gmra.mrb[46].mxu1 %v924_v14 }
 0x1fd   : > { %2435 = vmatpush3.bf16.msra.mxu0 %v2432_v33 }
 0x1fe   : > { %2437 = vmatprep.subr.bf16.mxu0 %v2436_v35 }
 0x201   : > { %2439 = vmatpush3.bf16.msra.mxu0 %v2436_v35 }
 0x28b   : > { %v2218_v28 = vpop.f32.mrb[16].mxu1 }
 0x28c   : > { %v1020_v57 = vadd.f32 %v2218_v28, %v3488_v30  ;;  %v1014_v34 = vpop.f32.mrb[17].mxu1 }
 0x28d   : > { %v1015_v23 = vadd.f32 %v3488_v30, %v1014_v34 }
 0x28e   : > { %v1206_v27 = vmul.f32 0.044715, %v1020_v57  ;;  %v1174_v8 = vmul.f32 0.5, %v1020_v57 }
 0x28f   : > { %v1205_v55 = vmul.f32 0.044715, %v1015_v23  ;;  %v1173_v1 = vmul.f32 0.5, %v1015_v23 }
 0x290   : > { %v1238_v31 = vmul.f32 %v1206_v27, %v1020_v57 }
 0x291   : > { %v1237_v3 = vmul.f32 %v1205_v55, %v1015_v23 }
 0x292   : > { %v1270_v13 = vmul.f32 %v1238_v31, %v1020_v57 }
 0x293   : > { %v1269_v0 = vmul.f32 %v1237_v3, %v1015_v23 }
 0x294   : > { %v1302_v52 = vadd.f32 %v1270_v13, %v1020_v57  ;;  %v2221_v16 = vpop.f32.mrb[18].mxu1 }
 0x295   : > { %v3493_v39 = vadd.f32 %v2221_v16, %v3488_v30  ;;  %v1024_v32 = vpop.f32.mrb[19].mxu1  ;;  %v1301_v18 = vadd.f32 %v1269_v0, %v1015_v23 }
 0x296   : > { %v1334_v49 = vmul.f32 0.7978846, %v1302_v52  ;;  %v3496_v43 = vadd.f32 %v3488_v30, %v1024_v32 }
 0x297   : > { %v1208_v15 = vmul.f32 0.044715, %v3493_v39  ;;  %v1333_v24 = vmul.f32 0.7978846, %v1301_v18 }
 0x298   : > { %2596 = vtanh.f32 %v1334_v49  ;;  %v1207_v61 = vmul.f32 0.044715, %v3496_v43  ;;  %v1175_v18 = vmul.f32 0.5, %v3496_v43 }
 0x299   : > { %v1240_v12 = vmul.f32 %v1208_v15, %v3493_v39  ;;  %2598 = vtanh.f32 %v1333_v24 }
 0x29a   : > { %v1239_v9 = vmul.f32 %v1207_v61, %v3496_v43 }
 0x29b   : > { %v1272_v22 = vmul.f32 %v1240_v12, %v3493_v39  ;;  %v2224_v42 = vpop.f32.mrb[20].mxu1 }
 0x29c   : > { %v1271_v29 = vmul.f32 %v1239_v9, %v3496_v43  ;;  %v3505_v20 = vadd.f32 %v2224_v42, %v3488_v30  ;;  %v1034_v5 = vpop.f32.mrb[21].mxu1 }
 0x29d   : > { %v1304_v58 = vadd.f32 %v1272_v22, %v3493_v39  ;;  %v3509_v60 = vadd.f32 %v3488_v30, %v1034_v5 }
 0x29e   : > { %v1303_v48 = vadd.f32 %v1271_v29, %v3496_v43  ;;  %v1210_v25 = vmul.f32 0.044715, %v3505_v20 }
 0x29f   : > { %v1336_v17 = vmul.f32 0.7978846, %v1304_v58  ;;  %v1209_v21 = vmul.f32 0.044715, %v3509_v60  ;;  %v2227_v45 = vpop.f32.mrb[22].mxu1 }
 0x2a0   : > { %v1335_v56 = vmul.f32 0.7978846, %v1303_v48  ;;  %v1242_v6 = vmul.f32 %v1210_v25, %v3505_v20  ;;  %v3516_v50 = vadd.f32 %v2227_v45, %v3488_v30  ;;  %v1044_v11 = vpop.f32.mrb[23].mxu1 }
 0x2a1   : > { %2600 = vtanh.f32 %v1336_v17  ;;  %v1241_v44 = vmul.f32 %v1209_v21, %v3509_v60  ;;  %v3520_v51 = vadd.f32 %v3488_v30, %v1044_v11  ;;  %v1176_v17 = vmul.f32 0.5, %v3493_v39 }
 0x2a2   : > { %v2597_v19 = vpop.eup %2596  ;;  %2602 = vtanh.f32 %v1335_v56  ;;  %v1212_v37 = vmul.f32 0.044715, %v3516_v50  ;;  %v1274_v26 = vmul.f32 %v1242_v6, %v3505_v20 }
 0x2a3   : > { %v2599_v14 = vpop.eup %2598  ;;  %v1398_v46 = vadd.f32 1.0, %v2597_v19  ;;  %v1211_v36 = vmul.f32 0.044715, %v3520_v51  ;;  %v2230_v62 = vpop.f32.mrb[24].mxu1  ;;  %v1273_v40 = vmul.f32 %v1241_v44, %v3509_v60 }
 0x2a4   : > { %v1397_v38 = vadd.f32 1.0, %v2599_v14  ;;  %v1244_v10 = vmul.f32 %v1212_v37, %v3516_v50  ;;  %v3528_v54 = vadd.f32 %v2230_v62, %v3488_v30  ;;  %v1054_v2 = vpop.f32.mrb[25].mxu1  ;;  %v1306_v63 = vadd.f32 %v1274_v26, %v3505_v20 }
 0x2a5   : > { %v1243_v59 = vmul.f32 %v1211_v36, %v3520_v51  ;;  %v3533_v47 = vadd.f32 %v3488_v30, %v1054_v2  ;;  %v1305_v53 = vadd.f32 %v1273_v40, %v3509_v60  ;;  %v1430_v41 = vmul.f32 %v1398_v46, %v1174_v8 }
 0x2a6   : > { %v1429_v4 = vmul.f32 %v1397_v38, %v1173_v1  ;;  %v1214_v33 = vmul.f32 0.044715, %v3528_v54  ;;  %v1338_v7 = vmul.f32 0.7978846, %v1306_v63  ;;  %v1276_v35 = vmul.f32 %v1244_v10, %v3516_v50 }
 0x2a7   : > { %v1213_v28 = vmul.f32 0.044715, %v3533_v47  ;;  %v2233_v57 = vpop.f32.mrb[26].mxu1  ;;  %v1337_v34 = vmul.f32 0.7978846, %v1305_v53  ;;  %v1275_v23 = vmul.f32 %v1243_v59, %v3520_v51  ;;  %v1178_v1 = vmul.f32 0.5, %v3505_v20 }
 0x2a8   : > { %2296 = vmatprep.mubr.f32.mxu0 %v1429_v4  ;;  %v1246_v27 = vmul.f32 %v1214_v33, %v3528_v54  ;;  %v3542_v55 = vadd.f32 %v2233_v57, %v3488_v30  ;;  %v1064_v31 = vpop.f32.mrb[27].mxu1  ;;  %2604 = vtanh.f32 %v1338_v7  ;;  %v1308_v3 = vadd.f32 %v1276_v35, %v3516_v50 }
 0x2a9   : > { %2297 = vmatmul.mubr.f32.vlgmr.msra.gmra.mrb[16].mxu0 %v1430_v41  ;;  %v1245_v13 = vmul.f32 %v1213_v28, %v3533_v47  ;;  %v3547_v0 = vadd.f32 %v3488_v30, %v1064_v31  ;;  %2606 = vtanh.f32 %v1337_v34  ;;  %v1307_v52 = vadd.f32 %v1275_v23, %v3520_v51 }
 0x2aa   : > { %v1216_v32 = vmul.f32 0.044715, %v3542_v55  ;;  %v1340_v49 = vmul.f32 0.7978846, %v1308_v3  ;;  %v1278_v15 = vmul.f32 %v1246_v27, %v3528_v54  ;;  %v1177_v7 = vmul.f32 0.5, %v3509_v60 }
 0x2ab   : > { %v2601_v16 = vpop.eup %2600  ;;  %v1215_v61 = vmul.f32 0.044715, %v3547_v0  ;;  %v2236_v12 = vpop.f32.mrb[28].mxu1  ;;  %v1339_v22 = vmul.f32 0.7978846, %v1307_v52  ;;  %v1277_v42 = vmul.f32 %v1245_v13, %v3533_v47  ;;  %v1180_v28 = vmul.f32 0.5, %v3516_v50 }
 0x2ac   : > { %v2603_v24 = vpop.eup %2602  ;;  %v1400_v9 = vadd.f32 1.0, %v2601_v16  ;;  %v1248_v29 = vmul.f32 %v1216_v32, %v3542_v55  ;;  %v3557_v5 = vadd.f32 %v2236_v12, %v3488_v30  ;;  %v1074_v58 = vpop.f32.mrb[29].mxu1  ;;  %2608 = vtanh.f32 %v1340_v49 }
 0x2ad   : > { %v1399_v48 = vadd.f32 1.0, %v2603_v24  ;;  %v1247_v43 = vmul.f32 %v1215_v61, %v3547_v0  ;;  %v3561_v25 = vadd.f32 %v3488_v30, %v1074_v58  ;;  %2610 = vtanh.f32 %v1339_v22 }
 0x2ae   : > { %v1218_v21 = vmul.f32 0.044715, %v3557_v5  ;;  %v1309_v56 = vadd.f32 %v1277_v42, %v3533_v47  ;;  %v1310_v6 = vadd.f32 %v1278_v15, %v3528_v54  ;;  %v1432_v44 = vmul.f32 %v1400_v9, %v1176_v17 }
 0x2af   : > { %v1431_v45 = vmul.f32 %v1399_v48, %v1175_v18  ;;  %v1217_v11 = vmul.f32 0.044715, %v3561_v25  ;;  %v2239_v19 = vpop.f32.mrb[30].mxu1  ;;  %v1279_v14 = vmul.f32 %v1247_v43, %v3547_v0  ;;  %v1280_v37 = vmul.f32 %v1248_v29, %v3542_v55 }
 0x2b0   : > { %v3571_v46 = vadd.f32 %v2239_v19, %v3488_v30  ;;  %v1084_v39 = vpop.f32.mrb[31].mxu1  ;;  %v1341_v26 = vmul.f32 0.7978846, %v1309_v56  ;;  %v1342_v36 = vmul.f32 0.7978846, %v1310_v6  ;;  %v1250_v10 = vmul.f32 %v1218_v21, %v3557_v5 }
 0x2b1   : > { %2299 = vmatprep.mubr.f32.mxu0 %v1431_v45  ;;  %v3574_v62 = vadd.f32 %v3488_v30, %v1084_v39  ;;  %v1311_v38 = vadd.f32 %v1279_v14, %v3547_v0  ;;  %v1312_v40 = vadd.f32 %v1280_v37, %v3542_v55  ;;  %v1249_v2 = vmul.f32 %v1217_v11, %v3561_v25 }
 0x2b2   : > { %2300 = vmatmul.mubr.f32.gmra.mrb[18].mxu0 %v1432_v44  ;;  %v2605_v8 = vpop.eup %2604  ;;  %v1220_v63 = vmul.f32 0.044715, %v3571_v46  ;;  %2612 = vtanh.f32 %v1341_v26  ;;  %v1282_v49 = vmul.f32 %v1250_v10, %v3557_v5  ;;  %v1179_v24 = vmul.f32 0.5, %v3520_v51 }
 0x2b3   : > { %v2607_v59 = vpop.eup %2606  ;;  %v1219_v4 = vmul.f32 0.044715, %v3574_v62  ;;  %v2242_v53 = vpop.f32.mrb[32].mxu1  ;;  %v1402_v33 = vadd.f32 1.0, %v2605_v8  ;;  %2614 = vtanh.f32 %v1342_v36  ;;  %v1343_v41 = vmul.f32 0.7978846, %v1311_v38 }
 0x2b4   : > { %v1094_v20 = vpop.f32.mrb[33].mxu1  ;;  %v1401_v35 = vadd.f32 1.0, %v2607_v59  ;;  %v1344_v57 = vmul.f32 0.7978846, %v1312_v40  ;;  %v1252_v34 = vmul.f32 %v1220_v63, %v3571_v46  ;;  %v3587_v23 = vadd.f32 %v2242_v53, %v3488_v30 }
 0x2b5   : > { %v3590_v27 = vadd.f32 %v3488_v30, %v1094_v20  ;;  %2616 = vtanh.f32 %v1343_v41  ;;  %v1251_v3 = vmul.f32 %v1219_v4, %v3574_v62  ;;  %v1281_v60 = vmul.f32 %v1249_v2, %v3561_v25 }
 0x2b6   : > { %v2609_v31 = vpop.eup %2608  ;;  %v1433_v13 = vmul.f32 %v1401_v35, %v1177_v7  ;;  %2618 = vtanh.f32 %v1344_v57  ;;  %v1434_v32 = vmul.f32 %v1402_v33, %v1178_v1  ;;  %v1182_v12 = vmul.f32 0.5, %v3528_v54 }
 0x2b7   : > { %v2611_v52 = vpop.eup %2610  ;;  %v1221_v50 = vmul.f32 0.044715, %v3590_v27  ;;  %v2245_v16 = vpop.f32.mrb[34].mxu1  ;;  %v1404_v18 = vadd.f32 1.0, %v2609_v31  ;;  %v1313_v9 = vadd.f32 %v1281_v60, %v3561_v25  ;;  %v1222_v22 = vmul.f32 0.044715, %v3587_v23 }
 0x2b8   : > { %v1104_v15 = vpop.f32.mrb[35].mxu1  ;;  %2302 = vmatprep.mubr.f32.mxu0 %v1433_v13  ;;  %v1403_v61 = vadd.f32 1.0, %v2611_v52  ;;  %v1181_v29 = vmul.f32 0.5, %v3533_v47  ;;  %v1314_v58 = vadd.f32 %v1282_v49, %v3557_v5  ;;  %v3606_v48 = vadd.f32 %v2245_v16, %v3488_v30 }
 0x2b9   : > { %v3601_v42 = vadd.f32 %v3488_v30, %v1104_v15  ;;  %2303 = vmatmul.mubr.f32.gmra.mrb[20].mxu0 %v1434_v32  ;;  %v1345_v51 = vmul.f32 0.7978846, %v1313_v9  ;;  %v1283_v17 = vmul.f32 %v1251_v3, %v3574_v62  ;;  %v1253_v54 = vmul.f32 %v1221_v50, %v3590_v27 }
 0x2ba   : > { %v1435_v43 = vmul.f32 %v1403_v61, %v1179_v24  ;;  %v1436_v45 = vmul.f32 %v1404_v18, %v1180_v28  ;;  %v1346_v56 = vmul.f32 0.7978846, %v1314_v58  ;;  %v1284_v6 = vmul.f32 %v1252_v34, %v3571_v46 }
 0x2bb   : > { %v2248_v21 = vpop.f32.mrb[36].mxu1  ;;  %v1183_v47 = vmul.f32 0.5, %v3547_v0  ;;  %v1184_v44 = vmul.f32 0.5, %v3542_v55  ;;  %2620 = vtanh.f32 %v1345_v51  ;;  %v1315_v14 = vadd.f32 %v1283_v17, %v3574_v62 }
 0x2bc   : > { %v2613_v11 = vpop.eup %2612  ;;  %v1114_v19 = vpop.f32.mrb[37].mxu1  ;;  %2305 = vmatprep.mubr.f32.mxu0 %v1435_v43  ;;  %v1223_v39 = vmul.f32 0.044715, %v3601_v42  ;;  %2622 = vtanh.f32 %v1346_v56  ;;  %v1185_v38 = vmul.f32 0.5, %v3561_v25  ;;  %v1316_v0 = vadd.f32 %v1284_v6, %v3571_v46 }
 0x2bd   : > { %v2615_v37 = vpop.eup %2614  ;;  %v3616_v26 = vadd.f32 %v3488_v30, %v1114_v19  ;;  %2306 = vmatmul.mubr.f32.gmra.mrb[22].mxu0 %v1436_v45  ;;  %v1405_v36 = vadd.f32 1.0, %v2613_v11  ;;  %v1347_v40 = vmul.f32 0.7978846, %v1315_v14  ;;  %v1254_v55 = vmul.f32 %v1222_v22, %v3587_v23 }
 0x2be   : > { %v1406_v1 = vadd.f32 1.0, %v2615_v37  ;;  %v1224_v10 = vmul.f32 0.044715, %v3606_v48  ;;  %v1285_v59 = vmul.f32 %v1253_v54, %v3590_v27  ;;  %v3624_v53 = vadd.f32 %v2248_v21, %v3488_v30 }
 0x2bf   : > { %v2617_v8 = vpop.eup %2616  ;;  %v2251_v2 = vpop.f32.mrb[38].mxu1  ;;  %v1437_v63 = vmul.f32 %v1405_v36, %v1181_v29  ;;  %v1186_v25 = vmul.f32 0.5, %v3557_v5  ;;  %v1255_v7 = vmul.f32 %v1223_v39, %v3601_v42  ;;  %v1225_v35 = vmul.f32 0.044715, %v3616_v26 }
 0x2c0   : > { %v2619_v4 = vpop.eup %2618  ;;  %v1124_v33 = vpop.f32.mrb[39].mxu1  ;;  %v1438_v41 = vmul.f32 %v1406_v1, %v1182_v12  ;;  %v1407_v20 = vadd.f32 1.0, %v2617_v8  ;;  %2624 = vtanh.f32 %v1347_v40  ;;  %v3630_v57 = vadd.f32 %v2251_v2, %v3488_v30 }
 0x2c1   : > { %2308 = vmatprep.mubr.f32.mxu0 %v1437_v63  ;;  %v1408_v28 = vadd.f32 1.0, %v2619_v4  ;;  %v1348_v31 = vmul.f32 0.7978846, %v1316_v0  ;;  %v1317_v3 = vadd.f32 %v1285_v59, %v3590_v27  ;;  %v1256_v13 = vmul.f32 %v1224_v10, %v3606_v48 }
 0x2c2   : > { %2309 = vmatmul.mubr.f32.gmra.mrb[24].mxu0 %v1438_v41  ;;  %v1439_v34 = vmul.f32 %v1407_v20, %v1183_v47  ;;  %v3635_v60 = vadd.f32 %v3488_v30, %v1124_v33  ;;  %v1187_v52 = vmul.f32 0.5, %v3574_v62  ;;  %v1286_v50 = vmul.f32 %v1254_v55, %v3587_v23 }
 0x2c3   : > { %v2254_v5 = vpop.f32.mrb[40].mxu1  ;;  %v1226_v16 = vmul.f32 0.044715, %v3624_v53  ;;  %v1440_v18 = vmul.f32 %v1408_v28, %v1184_v44  ;;  %2626 = vtanh.f32 %v1348_v31  ;;  %v1349_v49 = vmul.f32 0.7978846, %v1317_v3 }
 0x2c4   : > { %v1134_v32 = vpop.f32.mrb[41].mxu1  ;;  %2311 = vmatprep.mubr.f32.mxu0 %v1439_v34  ;;  %v3641_v15 = vadd.f32 %v2254_v5, %v3488_v30  ;;  %v3644_v24 = vmul.f32 0.5, %v3571_v46  ;;  %v3647_v61 = vmul.f32 0.5, %v3590_v27  ;;  %v1318_v62 = vadd.f32 %v1286_v50, %v3587_v23 }
 0x2c5   : > { %v2621_v12 = vpop.eup %2620  ;;  %v1257_v9 = vmul.f32 %v1225_v35, %v3616_v26  ;;  %v1228_v22 = vmul.f32 0.044715, %v3630_v57  ;;  %2628 = vtanh.f32 %v1349_v49  ;;  %v1287_v29 = vmul.f32 %v1255_v7, %v3601_v42 }
 0x2c6   : > { %2312 = vmatmul.mubr.f32.gmra.mrb[26].mxu0 %v1440_v18  ;;  %v2623_v58 = vpop.eup %2622  ;;  %v1227_v43 = vmul.f32 0.044715, %v3635_v60  ;;  %v1409_v46 = vadd.f32 1.0, %v2621_v12  ;;  %v1350_v17 = vmul.f32 0.7978846, %v1318_v62  ;;  %v1288_v27 = vmul.f32 %v1256_v13, %v3606_v48 }
 0x2c7   : > { %v2257_v51 = vpop.f32.mrb[42].mxu1  ;;  %v1258_v54 = vmul.f32 %v1226_v16, %v3624_v53  ;;  %v3657_v21 = vadd.f32 %v3488_v30, %v1134_v32  ;;  %v1410_v56 = vadd.f32 1.0, %v2623_v58  ;;  %v1319_v6 = vadd.f32 %v1287_v29, %v3601_v42 }
 0x2c8   : > { %v1144_v45 = vpop.f32.mrb[43].mxu1  ;;  %v1230_v11 = vmul.f32 0.044715, %v3641_v15  ;;  %v3662_v19 = vadd.f32 %v2257_v51, %v3488_v30  ;;  %v1441_v47 = vmul.f32 %v1409_v46, %v1185_v38  ;;  %2630 = vtanh.f32 %v1350_v17 }
 0x2c9   : > { %v3665_v44 = vadd.f32 %v3488_v30, %v1144_v45  ;;  %v1442_v14 = vmul.f32 %v1410_v56, %v1186_v25  ;;  %v1351_v37 = vmul.f32 0.7978846, %v1319_v6  ;;  %v1320_v39 = vadd.f32 %v1288_v27, %v3606_v48 }
 0x2ca   : > { %v2625_v36 = vpop.eup %2624  ;;  %v1260_v1 = vmul.f32 %v1228_v22, %v3630_v57  ;;  %v1259_v40 = vmul.f32 %v1227_v43, %v3635_v60  ;;  %2314 = vmatprep.mubr.f32.mxu0 %v1441_v47  ;;  %v1190_v8 = vmul.f32 0.5, %v3587_v23  ;;  %v1289_v55 = vmul.f32 %v1257_v9, %v3616_v26 }
 0x2cb   : > { %v2260_v0 = vpop.f32.mrb[44].mxu1  ;;  %v1229_v38 = vmul.f32 0.044715, %v3657_v21  ;;  %2315 = vmatmul.mubr.f32.gmra.mrb[28].mxu0 %v1442_v14  ;;  %v1411_v2 = vadd.f32 1.0, %v2625_v36  ;;  %v1191_v63 = vmul.f32 0.5, %v3601_v42  ;;  %2632 = vtanh.f32 %v1351_v37 }
 0x2cc   : > { %v1154_v10 = vpop.f32.mrb[45].mxu1  ;;  %v1262_v59 = vmul.f32 %v1230_v11, %v3641_v15  ;;  %v1232_v4 = vmul.f32 0.044715, %v3662_v19  ;;  %v1352_v33 = vmul.f32 0.7978846, %v1320_v39  ;;  %v1321_v41 = vadd.f32 %v1289_v55, %v3616_v26 }
 0x2cd   : > { %v2627_v20 = vpop.eup %2626  ;;  %v1231_v23 = vmul.f32 0.044715, %v3665_v44  ;;  %v3679_v25 = vadd.f32 %v2260_v0, %v3488_v30  ;;  %v1443_v7 = vmul.f32 %v1411_v2, %v1187_v52  ;;  %v1290_v35 = vmul.f32 %v1258_v54, %v3624_v53 }
 0x2ce   : > { %v3683_v28 = vadd.f32 %v3488_v30, %v1154_v10  ;;  %v1412_v42 = vadd.f32 1.0, %v2627_v20  ;;  %2634 = vtanh.f32 %v1352_v33  ;;  %v1353_v31 = vmul.f32 0.7978846, %v1321_v41 }
 0x2cf   : > { %v2263_v34 = vpop.f32.mrb[46].mxu1  ;;  %v2629_v3 = vpop.eup %2628  ;;  %v1261_v13 = vmul.f32 %v1229_v38, %v3657_v21  ;;  %2317 = vmatprep.mubr.f32.mxu0 %v1443_v7  ;;  %v1322_v16 = vadd.f32 %v1290_v35, %v3624_v53  ;;  %v1291_v52 = vmul.f32 %v1259_v40, %v3635_v60  ;;  %v1264_v32 = vmul.f32 %v1232_v4, %v3662_v19 }
 0x2d0   : > { %v3687_v5 = vadd.f32 %v2263_v34, %v3488_v30  ;;  %v1164_v50 = vpop.f32.mrb[47].mxu1  ;;  %v1444_v18 = vmul.f32 %v1412_v42, %v3644_v24  ;;  %v1413_v62 = vadd.f32 1.0, %v2629_v3  ;;  %v1234_v12 = vmul.f32 0.044715, %v3679_v25 }
 0x2d1   : > { %v3694_v49 = vadd.f32 %v3488_v30, %v1164_v50  ;;  %2636 = vtanh.f32 %v1353_v31  ;;  %v1354_v9 = vmul.f32 0.7978846, %v1322_v16  ;;  %v1323_v22 = vadd.f32 %v1291_v52, %v3635_v60 }
 0x2d2   : > { %v2631_v29 = vpop.eup %2630  ;;  %v1263_v58 = vmul.f32 %v1231_v23, %v3665_v44  ;;  %v1233_v43 = vmul.f32 0.044715, %v3683_v28  ;;  %2318 = vmatmul.mubr.f32.gmra.mrb[30].mxu0 %v1444_v18  ;;  %v1445_v51 = vmul.f32 %v1413_v62, %v3647_v61  ;;  %v1292_v24 = vmul.f32 %v1260_v1, %v3630_v57 }
 0x2d3   : > { %v1236_v30 = vmul.f32 0.044715, %v3687_v5  ;;  %v1414_v46 = vadd.f32 1.0, %v2631_v29  ;;  %2638 = vtanh.f32 %v1354_v9  ;;  %v1355_v17 = vmul.f32 0.7978846, %v1323_v22 }
 0x2d4   : > { %v1235_v27 = vmul.f32 0.044715, %v3694_v49  ;;  %2320 = vmatprep.mubr.f32.mxu0 %v1445_v51  ;;  %v1192_v54 = vmul.f32 0.5, %v3606_v48  ;;  %v1324_v45 = vadd.f32 %v1292_v24, %v3630_v57  ;;  %v1293_v56 = vmul.f32 %v1261_v13, %v3657_v21 }
 0x2d5   : > { %v2633_v6 = vpop.eup %2632  ;;  %v1266_v11 = vmul.f32 %v1234_v12, %v3679_v25  ;;  %v1446_v61 = vmul.f32 %v1414_v46, %v1190_v8  ;;  %2640 = vtanh.f32 %v1355_v17  ;;  %v1294_v47 = vmul.f32 %v1262_v59, %v3641_v15 }
 0x2d6   : > { %v1265_v14 = vmul.f32 %v1233_v43, %v3683_v28  ;;  %v1415_v37 = vadd.f32 1.0, %v2633_v6  ;;  %v1356_v39 = vmul.f32 0.7978846, %v1324_v45  ;;  %v1325_v36 = vadd.f32 %v1293_v56, %v3657_v21 }
 0x2d7   : > { %v1268_v1 = vmul.f32 %v1236_v30, %v3687_v5  ;;  %2321 = vmatmul.mubr.f32.gmra.mrb[32].mxu0 %v1446_v61  ;;  %v1326_v48 = vadd.f32 %v1294_v47, %v3641_v15  ;;  %v1295_v40 = vmul.f32 %v1263_v58, %v3665_v44  ;;  %v1296_v0 = vmul.f32 %v1264_v32, %v3662_v19 }
 0x2d8   : > { %v2635_v55 = vpop.eup %2634  ;;  %v1267_v8 = vmul.f32 %v1235_v27, %v3694_v49  ;;  %v1447_v38 = vmul.f32 %v1415_v37, %v1191_v63  ;;  %2642 = vtanh.f32 %v1356_v39  ;;  %v1357_v10 = vmul.f32 0.7978846, %v1325_v36 }
 0x2d9   : > { %v1416_v2 = vadd.f32 1.0, %v2635_v55  ;;  %v1358_v59 = vmul.f32 0.7978846, %v1326_v48  ;;  %v1327_v4 = vadd.f32 %v1295_v40, %v3665_v44  ;;  %v1328_v33 = vadd.f32 %v1296_v0, %v3662_v19 }
 0x2da   : > { %2323 = vmatprep.mubr.f32.mxu0 %v1447_v38  ;;  %2644 = vtanh.f32 %v1357_v10  ;;  %v1297_v41 = vmul.f32 %v1265_v14, %v3683_v28  ;;  %v1298_v20 = vmul.f32 %v1266_v11, %v3679_v25  ;;  %v1193_v63 = vmul.f32 0.5, %v3616_v26 }
 0x2db   : > { %v2637_v23 = vpop.eup %2636  ;;  %v1448_v7 = vmul.f32 %v1416_v2, %v1192_v54  ;;  %2646 = vtanh.f32 %v1358_v59  ;;  %v1359_v35 = vmul.f32 0.7978846, %v1327_v4  ;;  %v1360_v42 = vmul.f32 0.7978846, %v1328_v33 }
 0x2dc   : > { %v1417_v34 = vadd.f32 1.0, %v2637_v23  ;;  %v1329_v31 = vadd.f32 %v1297_v41, %v3683_v28  ;;  %v1330_v3 = vadd.f32 %v1298_v20, %v3679_v25  ;;  %v1194_v50 = vmul.f32 0.5, %v3624_v53 }
 0x2dd   : > { %v2639_v13 = vpop.eup %2638  ;;  %2324 = vmatmul.mubr.f32.gmra.mrb[34].mxu0 %v1448_v7  ;;  %2648 = vtanh.f32 %v1359_v35  ;;  %v1299_v16 = vmul.f32 %v1267_v8, %v3694_v49  ;;  %v1300_v52 = vmul.f32 %v1268_v1, %v3687_v5  ;;  %v1195_v58 = vmul.f32 0.5, %v3635_v60 }
 0x2de   : > { %v1449_v32 = vmul.f32 %v1417_v34, %v1193_v63  ;;  %v1418_v18 = vadd.f32 1.0, %v2639_v13  ;;  %2650 = vtanh.f32 %v1360_v42  ;;  %v1361_v62 = vmul.f32 0.7978846, %v1329_v31  ;;  %v2660_v34 = vld [vmem:[%s3135_s1 + $0x8] sm:$0xff]  ;;  %v2661_v31 = vld [vmem:[%s3135_s1] sm:$0xff] }
 0x2df   : > { %v2641_v12 = vpop.eup %2640  ;;  %v1362_v26 = vmul.f32 0.7978846, %v1330_v3  ;;  %v1331_v9 = vadd.f32 %v1299_v16, %v3694_v49  ;;  %v1332_v22 = vadd.f32 %v1300_v52, %v3687_v5  ;;  %v1196_v46 = vmul.f32 0.5, %v3630_v57 }
 0x2e0   : > { %2326 = vmatprep.mubr.f32.mxu0 %v1449_v32  ;;  %v1450_v29 = vmul.f32 %v1418_v18, %v1194_v50  ;;  %v1419_v53 = vadd.f32 1.0, %v2641_v12  ;;  %2652 = vtanh.f32 %v1361_v62  ;;  %v1197_v56 = vmul.f32 0.5, %v3657_v21  ;;  %v2662_v62 = vld [vmem:[%s3135_s1 + $0x18] sm:$0xff] }
 0x2e1   : > { %2654 = vtanh.f32 %v1362_v26  ;;  %v1363_v43 = vmul.f32 0.7978846, %v1331_v9  ;;  %v1364_v51 = vmul.f32 0.7978846, %v1332_v22  ;;  %v1198_v47 = vmul.f32 0.5, %v3641_v15  ;;  %v2663_v26 = vld [vmem:[%s3135_s1 + $0x10] sm:$0xff] }
 0x2e2   : > { %v2643_v24 = vpop.eup %2642  ;;  %2327 = vmatmul.mubr.f32.gmra.mrb[36].mxu0 %v1450_v29  ;;  %v1451_v30 = vmul.f32 %v1419_v53, %v1195_v58  ;;  %v1199_v37 = vmul.f32 0.5, %v3665_v44  ;;  %v1200_v21 = vmul.f32 0.5, %v3662_v19  ;;  %v1201_v0 = vmul.f32 0.5, %v3683_v28 }
 0x2e3   : > { %v1420_v17 = vadd.f32 1.0, %v2643_v24  ;;  %2656 = vtanh.f32 %v1363_v43  ;;  %v1203_v44 = vmul.f32 0.5, %v3694_v49  ;;  %v1202_v4 = vmul.f32 0.5, %v3679_v25  ;;  %v3741_v49 = vld [vmem:[%s3912_s6] ss:$0 sm:$0xff] }
 0x2e4   : > { %v2645_v27 = vpop.eup %2644  ;;  %2329 = vmatprep.mubr.f32.mxu0 %v1451_v30  ;;  %2658 = vtanh.f32 %v1364_v51  ;;  %v1204_v28 = vmul.f32 0.5, %v3687_v5  ;;  %v2664_v30 = vld [vmem:[%s3135_s1 + $0x28] sm:$0xff] }
 0x2e5   : > { %v2647_v54 = vpop.eup %2646  ;;  %v1452_v45 = vmul.f32 %v1420_v17, %v1196_v46  ;;  %v1421_v60 = vadd.f32 1.0, %v2645_v27 }
 0x2e6   : > { %v1422_v6 = vadd.f32 1.0, %v2647_v54  ;;  %v2665_v54 = vld [vmem:[%s3135_s1 + $0x20] sm:$0xff] }
 0x2e7   : > { %v2649_v11 = vpop.eup %2648  ;;  %2330 = vmatmul.mubr.f32.gmra.mrb[38].mxu0 %v1452_v45  ;;  %v1453_v61 = vmul.f32 %v1421_v60, %v1197_v56 }
 0x2e8   : > { %v2651_v14 = vpop.eup %2650  ;;  %v1423_v57 = vadd.f32 1.0, %v2649_v11  ;;  %v1454_v39 = vmul.f32 %v1422_v6, %v1198_v47  ;;  %v2666_v11 = vld [vmem:[%s3135_s1 + $0x38] sm:$0xff] }
 0x2e9   : > { %2332 = vmatprep.mubr.f32.mxu0 %v1453_v61  ;;  %v1424_v36 = vadd.f32 1.0, %v2651_v14  ;;  %v2667_v14 = vld [vmem:[%s3135_s1 + $0x30] sm:$0xff] }
 0x2ea   : > { %v2653_v1 = vpop.eup %2652  ;;  %v1455_v48 = vmul.f32 %v1423_v57, %v1199_v37 }
 0x2eb   : > { %v2655_v40 = vpop.eup %2654  ;;  %2333 = vmatmul.mubr.f32.gmra.mrb[40].mxu0 %v1454_v39  ;;  %v1425_v55 = vadd.f32 1.0, %v2653_v1  ;;  %v1456_v38 = vmul.f32 %v1424_v36, %v1200_v21  ;;  %v2668_v21 = vld [vmem:[%s3135_s1 + $0x48] sm:$0xff] }
 0x2ec   : > { %2335 = vmatprep.mubr.f32.mxu0 %v1455_v48  ;;  %v1426_v10 = vadd.f32 1.0, %v2655_v40 }
 0x2ed   : > { %v2657_v8 = vpop.eup %2656  ;;  %v1457_v15 = vmul.f32 %v1425_v55, %v1201_v0 }
 0x2ee   : > { %v2659_v2 = vpop.eup %2658  ;;  %v1427_v59 = vadd.f32 1.0, %v2657_v8  ;;  %v1458_v41 = vmul.f32 %v1426_v10, %v1202_v4 }
 0x2ef   : > { %2336 = vmatmul.mubr.f32.gmra.mrb[42].mxu0 %v1456_v38  ;;  %v1428_v19 = vadd.f32 1.0, %v2659_v2  ;;  %v2669_v38 = vld [vmem:[%s3135_s1 + $0x40] sm:$0xff] }
 0x2f0   : > { %2338 = vmatprep.mubr.f32.mxu0 %v1457_v15  ;;  %v1459_v33 = vmul.f32 %v1427_v59, %v1203_v44  ;;  %v2670_v59 = vld [vmem:[%s3135_s1 + $0x58] sm:$0xff] }
 0x2f1   : > { %v1460_v20 = vmul.f32 %v1428_v19, %v1204_v28 }
 0x2f3   : > { %2339 = vmatmul.mubr.f32.gmra.mrb[44].mxu0 %v1458_v41 }
 0x2f4   : > { %2341 = vmatprep.mubr.f32.mxu0 %v1459_v33  ;;  %v2671_v33 = vld [vmem:[%s3135_s1 + $0x50] sm:$0xff] }
 0x2f7   : > { %2342 = vmatmul.mubr.f32.gmra.mrb[46].mxu0 %v1460_v20 }
 0x37c   : > { %v2298_v23 = vpop.f32.mrb[16].mxu0 }
 0x37d   : > { %v1556_v25 = vadd.f32 %v2298_v23, %v3741_v49  ;;  %v1550_v7 = vpop.f32.mrb[17].mxu0 }
 0x37e   : > { %v1551_v35 = vadd.f32 %v3741_v49, %v1550_v7 }
 0x37f   : > { %v1710_v42 = vmax.f32 %v1556_v25, 0.0 }
 0x380   : > { %v1709_v63 = vmax.f32 %v1551_v35, 0.0  ;;  %v2672_v35 = vld [vmem:[%s3135_s1 + $0x68] sm:$0xff] }
 0x381   : > { %v1742_v5 = vadd.f32 %v2660_v34, %v1710_v42 }
 0x382   : > { %v1741_v3 = vadd.f32 %v2661_v31, %v1709_v63  ;;  %v2673_v63 = vld [vmem:[%s3135_s1 + $0x60] sm:$0xff] }
 0x383   : > { %1774 = vst [vmem:[%s3749_s24 + $0x8] sm:$0xff] %v1742_v5 }
 0x384   : > { %1773 = vst [vmem:[%s3749_s24] sm:$0xff] %v1741_v3 }
 0x385   : > { %v2301_v13 = vpop.f32.mrb[18].mxu0 }
 0x386   : > { %v1566_v50 = vadd.f32 %v2301_v13, %v3741_v49  ;;  %v1560_v16 = vpop.f32.mrb[19].mxu0 }
 0x387   : > { %v1561_v52 = vadd.f32 %v3741_v49, %v1560_v16 }
 0x388   : > { %v1712_v32 = vmax.f32 %v1566_v50, 0.0 }
 0x389   : > { %v1711_v18 = vmax.f32 %v1561_v52, 0.0  ;;  %v2674_v52 = vld [vmem:[%s3135_s1 + $0x78] sm:$0xff] }
 0x38a   : > { %v1744_v12 = vadd.f32 %v2662_v62, %v1712_v32  ;;  %v2675_v62 = vld [vmem:[%s3135_s1 + $0x70] sm:$0xff] }
 0x38b   : > { %v1743_v9 = vadd.f32 %v2663_v26, %v1711_v18 }
 0x38c   : > { %1776 = vst [vmem:[%s3749_s24 + $0x18] sm:$0xff] %v1744_v12  ;;  %v2304_v22 = vpop.f32.mrb[20].mxu0 }
 0x38d   : > { %1775 = vst [vmem:[%s3749_s24 + $0x10] sm:$0xff] %v1743_v9  ;;  %v1576_v29 = vadd.f32 %v2304_v22, %v3741_v49  ;;  %v1570_v58 = vpop.f32.mrb[21].mxu0 }
 0x38e   : > { %v1571_v53 = vadd.f32 %v3741_v49, %v1570_v58 }
 0x38f   : > { %v1714_v43 = vmax.f32 %v1576_v29, 0.0 }
 0x390   : > { %v1713_v51 = vmax.f32 %v1571_v53, 0.0  ;;  %v2307_v24 = vpop.f32.mrb[22].mxu0  ;;  %v2676_v53 = vld [vmem:[%s3135_s1 + $0x88] sm:$0xff] }
 0x391   : > { %v1746_v46 = vadd.f32 %v2664_v30, %v1714_v43  ;;  %v1586_v17 = vadd.f32 %v2307_v24, %v3741_v49  ;;  %v1580_v27 = vpop.f32.mrb[23].mxu0 }
 0x392   : > { %v1745_v45 = vadd.f32 %v2665_v54, %v1713_v51  ;;  %v1581_v56 = vadd.f32 %v3741_v49, %v1580_v27  ;;  %v2677_v51 = vld [vmem:[%s3135_s1 + $0x80] sm:$0xff] }
 0x393   : > { %1778 = vst [vmem:[%s3749_s24 + $0x28] sm:$0xff] %v1746_v46  ;;  %v1716_v60 = vmax.f32 %v1586_v17, 0.0 }
 0x394   : > { %1777 = vst [vmem:[%s3749_s24 + $0x20] sm:$0xff] %v1745_v45  ;;  %v1715_v6 = vmax.f32 %v1581_v56, 0.0  ;;  %v2678_v56 = vld [vmem:[%s3135_s1 + $0x98] sm:$0xff] }
 0x395   : > { %v1748_v61 = vadd.f32 %v2666_v11, %v1716_v60  ;;  %v2310_v47 = vpop.f32.mrb[24].mxu0  ;;  %v2679_v11 = vld [vmem:[%s3135_s1 + $0x90] sm:$0xff] }
 0x396   : > { %v1747_v37 = vadd.f32 %v2667_v14, %v1715_v6  ;;  %v1596_v57 = vadd.f32 %v2310_v47, %v3741_v49  ;;  %v1590_v39 = vpop.f32.mrb[25].mxu0 }
 0x397   : > { %1780 = vst [vmem:[%s3749_s24 + $0x38] sm:$0xff] %v1748_v61  ;;  %v1591_v36 = vadd.f32 %v3741_v49, %v1590_v39 }
 0x398   : > { %1779 = vst [vmem:[%s3749_s24 + $0x30] sm:$0xff] %v1747_v37  ;;  %v1718_v1 = vmax.f32 %v1596_v57, 0.0 }
 0x399   : > { %v1717_v48 = vmax.f32 %v1591_v36, 0.0  ;;  %v2313_v40 = vpop.f32.mrb[26].mxu0  ;;  %v2680_v36 = vld [vmem:[%s3135_s1 + $0xa8] sm:$0xff] }
 0x39a   : > { %v1750_v0 = vadd.f32 %v2668_v21, %v1718_v1  ;;  %v1606_v55 = vadd.f32 %v2313_v40, %v3741_v49  ;;  %v1600_v8 = vpop.f32.mrb[27].mxu0  ;;  %v2681_v40 = vld [vmem:[%s3135_s1 + $0xa0] sm:$0xff] }
 0x39b   : > { %v1749_v15 = vadd.f32 %v2669_v38, %v1717_v48  ;;  %v1601_v10 = vadd.f32 %v3741_v49, %v1600_v8 }
 0x39c   : > { %1782 = vst [vmem:[%s3749_s24 + $0x48] sm:$0xff] %v1750_v0  ;;  %v1720_v2 = vmax.f32 %v1606_v55, 0.0 }
 0x39d   : > { %1781 = vst [vmem:[%s3749_s24 + $0x40] sm:$0xff] %v1749_v15  ;;  %v1719_v44 = vmax.f32 %v1601_v10, 0.0 }
 0x39e   : > { %v1752_v4 = vadd.f32 %v2670_v59, %v1720_v2  ;;  %v2316_v19 = vpop.f32.mrb[28].mxu0  ;;  %v2682_v2 = vld [vmem:[%s3135_s1 + $0xb8] sm:$0xff] }
 0x39f   : > { %v1751_v41 = vadd.f32 %v2671_v33, %v1719_v44  ;;  %v1616_v28 = vadd.f32 %v2316_v19, %v3741_v49  ;;  %v1610_v20 = vpop.f32.mrb[29].mxu0  ;;  %v2683_v33 = vld [vmem:[%s3135_s1 + $0xb0] sm:$0xff] }
 0x3a0   : > { %1784 = vst [vmem:[%s3749_s24 + $0x58] sm:$0xff] %v1752_v4  ;;  %v1611_v23 = vadd.f32 %v3741_v49, %v1610_v20 }
 0x3a1   : > { %1783 = vst [vmem:[%s3749_s24 + $0x50] sm:$0xff] %v1751_v41  ;;  %v1722_v25 = vmax.f32 %v1616_v28, 0.0 }
 0x3a2   : > { %v1721_v7 = vmax.f32 %v1611_v23, 0.0 }
 0x3a3   : > { %v1754_v42 = vadd.f32 %v2672_v35, %v1722_v25  ;;  %v2684_v25 = vld [vmem:[%s3135_s1 + $0xc8] sm:$0xff] }
 0x3a4   : > { %v1753_v34 = vadd.f32 %v2673_v63, %v1721_v7  ;;  %v2685_v63 = vld [vmem:[%s3135_s1 + $0xc0] sm:$0xff] }
 0x3a5   : > { %1786 = vst [vmem:[%s3749_s24 + $0x68] sm:$0xff] %v1754_v42  ;;  %v2319_v5 = vpop.f32.mrb[30].mxu0 }
 0x3a6   : > { %1785 = vst [vmem:[%s3749_s24 + $0x60] sm:$0xff] %v1753_v34  ;;  %v1626_v31 = vadd.f32 %v2319_v5, %v3741_v49  ;;  %v1620_v3 = vpop.f32.mrb[31].mxu0 }
 0x3a7   : > { %v1621_v13 = vadd.f32 %v3741_v49, %v1620_v3 }
 0x3a8   : > { %v1724_v50 = vmax.f32 %v1626_v31, 0.0 }
 0x3a9   : > { %v1723_v16 = vmax.f32 %v1621_v13, 0.0 }
 0x3aa   : > { %v1756_v32 = vadd.f32 %v2674_v52, %v1724_v50  ;;  %v2322_v18 = vpop.f32.mrb[32].mxu0  ;;  %v2686_v50 = vld [vmem:[%s3135_s1 + $0xd8] sm:$0xff] }
 0x3ab   : > { %v1755_v12 = vadd.f32 %v2675_v62, %v1723_v16  ;;  %v1636_v26 = vadd.f32 %v2322_v18, %v3741_v49  ;;  %v1630_v9 = vpop.f32.mrb[33].mxu0  ;;  %v2687_v18 = vld [vmem:[%s3135_s1 + $0xd0] sm:$0xff] }
 0x3ac   : > { %1788 = vst [vmem:[%s3749_s24 + $0x78] sm:$0xff] %v1756_v32  ;;  %v1631_v22 = vadd.f32 %v3741_v49, %v1630_v9 }
 0x3ad   : > { %1787 = vst [vmem:[%s3749_s24 + $0x70] sm:$0xff] %v1755_v12  ;;  %v1726_v29 = vmax.f32 %v1636_v26, 0.0 }
 0x3ae   : > { %v1725_v58 = vmax.f32 %v1631_v22, 0.0 }
 0x3af   : > { %v1758_v43 = vadd.f32 %v2676_v53, %v1726_v29  ;;  %v2688_v29 = vld [vmem:[%s3135_s1 + $0xe8] sm:$0xff] }
 0x3b0   : > { %v1757_v24 = vadd.f32 %v2677_v51, %v1725_v58  ;;  %v2325_v30 = vpop.f32.mrb[34].mxu0  ;;  %v2689_v51 = vld [vmem:[%s3135_s1 + $0xe0] sm:$0xff] }
 0x3b1   : > { %1790 = vst [vmem:[%s3749_s24 + $0x88] sm:$0xff] %v1758_v43  ;;  %v1646_v46 = vadd.f32 %v2325_v30, %v3741_v49  ;;  %v1640_v17 = vpop.f32.mrb[35].mxu0 }
 0x3b2   : > { %1789 = vst [vmem:[%s3749_s24 + $0x80] sm:$0xff] %v1757_v24  ;;  %v1641_v27 = vadd.f32 %v3741_v49, %v1640_v17 }
 0x3b3   : > { %v1728_v54 = vmax.f32 %v1646_v46, 0.0 }
 0x3b4   : > { %v1727_v45 = vmax.f32 %v1641_v27, 0.0  ;;  %v2690_v27 = vld [vmem:[%s3135_s1 + $0xf8] sm:$0xff] }
 0x3b5   : > { %v1760_v60 = vadd.f32 %v2678_v56, %v1728_v54  ;;  %v2328_v6 = vpop.f32.mrb[36].mxu0 }
 0x3b6   : > { %v1759_v61 = vadd.f32 %v2679_v11, %v1727_v45  ;;  %v1656_v47 = vadd.f32 %v2328_v6, %v3741_v49  ;;  %v1650_v14 = vpop.f32.mrb[37].mxu0  ;;  %v2691_v45 = vld [vmem:[%s3135_s1 + $0xf0] sm:$0xff] }
 0x3b7   : > { %1792 = vst [vmem:[%s3749_s24 + $0x98] sm:$0xff] %v1760_v60  ;;  %v1651_v37 = vadd.f32 %v3741_v49, %v1650_v14 }
 0x3b8   : > { %1791 = vst [vmem:[%s3749_s24 + $0x90] sm:$0xff] %v1759_v61  ;;  %v1730_v57 = vmax.f32 %v1656_v47, 0.0 }
 0x3b9   : > { %v1729_v39 = vmax.f32 %v1651_v37, 0.0 }
 0x3ba   : > { %v1762_v1 = vadd.f32 %v2680_v36, %v1730_v57  ;;  %v2331_v48 = vpop.f32.mrb[38].mxu0 }
 0x3bb   : > { %v1761_v21 = vadd.f32 %v2681_v40, %v1729_v39  ;;  %v1666_v0 = vadd.f32 %v2331_v48, %v3741_v49  ;;  %v1660_v55 = vpop.f32.mrb[39].mxu0 }
 0x3bc   : > { %1794 = vst [vmem:[%s3749_s24 + $0xa8] sm:$0xff] %v1762_v1  ;;  %v1661_v8 = vadd.f32 %v3741_v49, %v1660_v55 }
 0x3bd   : > { %1793 = vst [vmem:[%s3749_s24 + $0xa0] sm:$0xff] %v1761_v21  ;;  %v1732_v38 = vmax.f32 %v1666_v0, 0.0 }
 0x3be   : > { %v1731_v15 = vmax.f32 %v1661_v8, 0.0  ;;  %v2334_v10 = vpop.f32.mrb[40].mxu0 }
 0x3bf   : > { %v1764_v44 = vadd.f32 %v2682_v2, %v1732_v38  ;;  %v1676_v59 = vadd.f32 %v2334_v10, %v3741_v49  ;;  %v1670_v4 = vpop.f32.mrb[41].mxu0 }
 0x3c0   : > { %v1763_v41 = vadd.f32 %v2683_v33, %v1731_v15  ;;  %v1671_v19 = vadd.f32 %v3741_v49, %v1670_v4 }
 0x3c1   : > { %1796 = vst [vmem:[%s3749_s24 + $0xb8] sm:$0xff] %v1764_v44  ;;  %v1734_v28 = vmax.f32 %v1676_v59, 0.0 }
 0x3c2   : > { %1795 = vst [vmem:[%s3749_s24 + $0xb0] sm:$0xff] %v1763_v41  ;;  %v1733_v20 = vmax.f32 %v1671_v19, 0.0  ;;  %v2337_v23 = vpop.f32.mrb[42].mxu0 }
 0x3c3   : > { %v1766_v7 = vadd.f32 %v2684_v25, %v1734_v28  ;;  %v1686_v35 = vadd.f32 %v2337_v23, %v3741_v49  ;;  %v1680_v42 = vpop.f32.mrb[43].mxu0 }
 0x3c4   : > { %v1765_v34 = vadd.f32 %v2685_v63, %v1733_v20  ;;  %v1681_v5 = vadd.f32 %v3741_v49, %v1680_v42 }
 0x3c5   : > { %1798 = vst [vmem:[%s3749_s24 + $0xc8] sm:$0xff] %v1766_v7  ;;  %v1736_v31 = vmax.f32 %v1686_v35, 0.0 }
 0x3c6   : > { %1797 = vst [vmem:[%s3749_s24 + $0xc0] sm:$0xff] %v1765_v34  ;;  %v1735_v3 = vmax.f32 %v1681_v5, 0.0  ;;  %v2340_v13 = vpop.f32.mrb[44].mxu0 }
 0x3c7   : > { %v1768_v16 = vadd.f32 %v2686_v50, %v1736_v31  ;;  %v1696_v52 = vadd.f32 %v2340_v13, %v3741_v49  ;;  %v1690_v32 = vpop.f32.mrb[45].mxu0 }
 0x3c8   : > { %v1767_v62 = vadd.f32 %v2687_v18, %v1735_v3  ;;  %v1691_v12 = vadd.f32 %v3741_v49, %v1690_v32 }
 0x3c9   : > { %1800 = vst [vmem:[%s3749_s24 + $0xd8] sm:$0xff] %v1768_v16  ;;  %v1738_v26 = vmax.f32 %v1696_v52, 0.0 }
 0x3ca   : > { %1799 = vst [vmem:[%s3749_s24 + $0xd0] sm:$0xff] %v1767_v62  ;;  %v1737_v9 = vmax.f32 %v1691_v12, 0.0  ;;  %v2343_v22 = vpop.f32.mrb[46].mxu0 }
 0x3cb   : > { %v1770_v58 = vadd.f32 %v2688_v29, %v1738_v26  ;;  %v1706_v53 = vadd.f32 %v2343_v22, %v3741_v49  ;;  %v1700_v43 = vpop.f32.mrb[47].mxu0 }
 0x3cc   : > { %v1769_v24 = vadd.f32 %v2689_v51, %v1737_v9  ;;  %v1701_v30 = vadd.f32 %v3741_v49, %v1700_v43  ;;  %1812 = sbr.rel (!%p3949_p1) target bundleno = 1007 (0x3ef), region = 68 }
 0x3cd   : > { %1802 = vst [vmem:[%s3749_s24 + $0xe8] sm:$0xff] %v1770_v58  ;;  %v1740_v46 = vmax.f32 %v1706_v53, 0.0 }
 0x3ce   : > { %1801 = vst [vmem:[%s3749_s24 + $0xe0] sm:$0xff] %v1769_v24  ;;  %v1739_v17 = vmax.f32 %v1701_v30, 0.0 }
 0x3cf   : > { %v1772_v54 = vadd.f32 %v2690_v27, %v1740_v46 }
 0x3d0   : > { %v1771_v56 = vadd.f32 %v2691_v45, %v1739_v17 }
 0x3d1   : > { %1804 = vst [vmem:[%s3749_s24 + $0xf8] sm:$0xff] %v1772_v54 }
 0x3d2   : > { %1803 = vst [vmem:[%s3749_s24 + $0xf0] sm:$0xff] %v1771_v56 }
 0x3d3   : > { %s3961_s18 = smov (!%p1815_p3, %s1814_s18), 32 }
 0x3d4   : > { %s3847_s10 = sshll.u32 %s3961_s18, 7 }
 0x3d5   : > { %s1819_s22 = ssub.s32 4096, %s3847_s10 }
 0x3d6   : > { %1820 = vsyncadd %s1806_s9, %s1819_s22  ;;  %p1952_p5 = scmp.ne.s32.totalorder %s3847_s10, 0  ;;  %s1959_s13 = sshll.u32 %s2952_s28, 12 }
 0x3d7   : > { %s3857_s8 = scalar_lea.hbm %s3913_s7, %s1959_s13  ;;  %s1825_s17 = sshll.u32 %s3749_s24, 4  ;;  %s3860_s17 = int_to_ptr.vmem [resolvable:$true] %s1825_s17 }
 0x3d8   : > { %s2804_s20 = scalar_lea.vmem %s3860_s17, %s3847_s10  ;;  %s2888_s1 = smov [#allocation10]  }
 0x3d9   : > { %p2805_p6 = scmp.ne.s32.totalorder %s3860_s17, %s2804_s20  ;;  %s2808_s12 = sshll.u32 %s2888_s1, 4  ;;  %s2809_s12 = int_to_ptr.vmem [resolvable:$false] %s2808_s12 }
 0x3da   : > { %s2810_s28 = scalar_lea.vmem %s2809_s12, 8192  ;;  %p2811_p0 = scmp.lt.s32.totalorder %s3860_s17, %s2809_s12 }
 0x3db   : > { %p2806_p11 = pnand %p2805_p6, %p1952_p5  ;;  %p2812_p12 = scmp.lt.s32.totalorder %s2810_s28, %s2804_s20 }
 0x3dd   : > { %p2807_p13 = pneg %p2806_p11  ;;  %p2813_p7 = por %p2812_p12, %p2811_p0 }
 0x3df   : > { %p2814_p2 = pnand %p2813_p7, %p2807_p13 }
 0x3e1   : > { %2817 = shalt.err (!%p2814_p2)
}
 0x3e2   : > { %s2818_s15 = scalar_lea.hbm %s3857_s8, %s3847_s10  ;;  %s2822_s19 = scalar_lea.hbm %s3913_s7, 5120 }
 0x3e3   : > { %p2819_p8 = scmp.ne.s32.totalorder %s3857_s8, %s2818_s15  ;;  %p2823_p1 = scmp.lt.u32.totalorder %s3857_s8, %s3913_s7 }
 0x3e4   : > { %p2824_p3 = scmp.lt.u32.totalorder %s2822_s19, %s2818_s15  ;;  %p2826_p11 = scmp.lt.u32.totalorder %s2818_s15, %s3857_s8 }
 0x3e5   : > { %p2820_p9 = pnand %p2819_p8, %p1952_p5 }
 0x3e6   : > { %p2825_p6 = por %p2824_p3, %p2823_p1 }
 0x3e7   : > { %p2821_p10 = pneg %p2820_p9 }
 0x3e8   : > { %p2827_p13 = por %p2826_p11, %p2825_p6 }
 0x3ea   : > { %p2828_p0 = pnand %p2827_p13, %p2821_p10 }
 0x3ec   : > { %2831 = shalt.err (!%p2828_p0)
}
 0x3ed   : > { %s2889_s30 = smov 128   ;;  %s2890_s18 = smov 8  }
 0x3ee   : > { %1831 = dma.vmem_to_hbm [thread:$0]  (%p1952_p5), %s3860_s17, %s3847_s10, %s3857_s8, %s1806_s9, %s2889_s30, %s2889_s30, %s2890_s18  }
 0x3ef PF: > { %s3950_s22 = sld [smem:[#allocation15_spill]]  ;;  %s3951_s13 = sld [smem:[#allocation18_spill]] }
 0x3f5   : > { %s1840_s14 = sand.u32 1, %s3950_s22   ;;  %p3952_p12 = scmp.ne.s32.totalorder %s3951_s13, 0 }
 0x3f6   : > { %s1841_s11 = scalar_lea.sflag [#allocation4], %s1840_s14 }
 0x3f7   : > { %p2481_p7 = pnand %p1932_p4, %p3952_p12 }
 0x3f9   : > { %2861 = dma.done.wait (!%p2481_p7), %s1841_s11, 4096  }
 0x3fa   : > { %2863 = vsyncadd (!%p2481_p7), %s1841_s11, 4294963200  ;;  %s3953_s27 = sld [smem:[#allocation16_spill]]  ;;  %s3954_s20 = sld [smem:[#allocation17_spill]] }
 0x3fb   : > { %s3955_s24 = smov %s2870_s25  ;;  %s3956_s25 = smov %s2874_s26 }
 0x400   : > { %p22_p2 = scmp.ge.s32.totalorder %s3953_s27, 4   ;;  %s3957_s26 = smov %s3954_s20 }
 0x402   :  { %24 = sbr.rel (!%p22_p2) target bundleno = 9 (0x9), region = 105 }
 0x409   :  { %1846 = vsyncpa [#allocation3], 1 }
 0x40a   :  { %1848 = vsyncpa [#allocation3 + $0x1], 1 }
 0x40b   :  { %1849 = vsyncpa [#allocation6], 1 }
 0x40c   :  { %1850 = vsyncpa [#allocation9], 1 }
 0x40d   :  { %1851 = vsyncpa [#allocation4], 1 }
 0x40e   :  { %1853 = vsyncpa [#allocation4 + $0x1], 1 }

</bundles_post_ra>
